<compile_context>
chip_gen: v5e
topology: v5e:2x2
jax: 0.10.0
libtpu: 0.0.40
codegen_flags: <defaults>
</compile_context>

<pallas_src>
import jax
import jax.numpy as jnp
from jax import lax
from jax.experimental import pallas as pl
from jax.experimental.pallas import tpu as pltpu

# Architecture implied by Net(planes, ...): 7 valid convs (k=3 x6, then k=4),
# BN+ReLU after each, MaxPool2d(2) after conv2, global max pool, fc, log_softmax.
# Spatial trace for a 28x28 input: 28->26->24->(mp)12->10->8->6->4->1.
_KSIZES = (3, 3, 3, 3, 3, 3, 4)
_POOL_AFTER = 2          # MaxPool2d(2) sits after conv2
_GRID = 32               # fixed padded anchor grid (28x28 lives in its top-left)
_BN_EPS = 1e-5


def _vmem():
    return pl.BlockSpec(memory_space=pltpu.MemorySpace.VMEM)


def _make_net_kernel(S, batch, planes):
    """Builds the fused forward kernel for a fixed (grid, batch, planes)."""
    mtot = S * S * batch                 # lane-axis length, multiple of 128

    def shift_left(x, off):
        # tap[c, m] = x[c, (m + off) % mtot]; the wrapped tail only ever lands
        # on anchors outside the valid region, so it is harmless.
        if off == 0:
            return x
        return pltpu.roll(x, mtot - off, 1)          # XLU lane rotation

    def build_patch(x, ksize, stride):
        # (ksize*ksize*Cin, M) patch matrix: each tap is a pure lane roll of
        # the (Cin, M) activation; taps stack on the K/sublane axis (whole-vreg
        # moves) -> a single MXU GEMM per conv layer.
        taps = []
        for kh in range(ksize):
            for kw in range(ksize):
                off = (kh * stride * S + kw * stride) * batch
                taps.append(shift_left(x, off))
        return jnp.concatenate(taps, axis=0)

    def kernel(p1_ref, w1, w2, w3, w4, w5, w6, w7,
               b_ref, wfc_ref, bfc_ref, o_ref):
        conv_ws = (w1, w2, w3, w4, w5, w6, w7)

        def conv_bn_relu(patch, layer):
            # (Cout, K) @ (K, M) with M lane-dense; BN scale is pre-folded into
            # the weights so only a per-channel shift remains (f32 throughout).
            y = jnp.dot(conv_ws[layer][...], patch,
                        preferred_element_type=jnp.float32)
            shift = b_ref[layer * planes:(layer + 1) * planes, :]   # (Cout, 1)
            return jnp.maximum(y + shift, 0.0)

        # conv1 consumes the patch matrix pre-built in the wrapper (Cin=1).
        x = conv_bn_relu(p1_ref[...], 0)                            # (planes, M)
        stride = 1
        for layer in range(1, len(_KSIZES)):
            if layer == _POOL_AFTER:
                # Non-compacting MaxPool2d(2): max over the 4 window taps; the
                # anchor grid keeps its lane layout and downstream tap offsets
                # are dilated by 2, so the pool costs 3 rolls + 3 maxes.
                x = jnp.maximum(
                    jnp.maximum(x, shift_left(x, stride * batch)),
                    jnp.maximum(shift_left(x, stride * S * batch),
                                shift_left(x, stride * (S + 1) * batch)))
                stride *= 2
            x = conv_bn_relu(build_patch(x, _KSIZES[layer], stride), layer)

        # gmp + view: the conv7 valid map is 1x1, i.e. the anchor-(0,0) lanes.
        # fc is applied full-width (same proven (.., M) GEMM shape), then the
        # valid batch columns are sliced; log_softmax runs over the class
        # (sublane) axis of the (num_classes, B) result.
        zf = jnp.dot(wfc_ref[...], x, preferred_element_type=jnp.float32)
        z = zf[:, 0:batch] + bfc_ref[...]                           # (nc, B)
        m = jnp.max(z, axis=0, keepdims=True)
        lse = jnp.log(jnp.sum(jnp.exp(z - m), axis=0, keepdims=True)) + m
        o_ref[...] = z - lse

    return kernel


@jax.jit
def net_forward(x_nchw, conv_ws, b_stack, wfc_t, bfc_t):
    """Fused Net.forward.  x_nchw: (B, 1, 28, 28) f32 -> (B, num_classes)."""
    batch, _, hin, win = x_nchw.shape
    planes = conv_ws[0].shape[0]
    num_classes = wfc_t.shape[0]
    S = _GRID

    # Channel-major layout on a fixed SxS anchor grid:
    #   flat[(h*S + w)*B + b] = x[b, 0, h, w], zero-padded to 32x32 so the lane
    #   axis M = S*S*B is a multiple of 128 (lane-dense, unmasked stores).
    x = jnp.pad(x_nchw[:, 0], ((0, 0), (0, S - hin), (0, S - win)))
    flat = jnp.transpose(x, (1, 2, 0)).reshape(S * S * batch)
    # Pre-im2col conv1 (Cin=1): 9 shifted copies stacked on the K axis,
    # zero-padded on K to match the sublane-aligned folded conv1 weight.
    k0 = _KSIZES[0]
    p1 = jnp.stack([jnp.roll(flat, -(kh * S + kw) * batch)
                    for kh in range(k0) for kw in range(k0)], axis=0)
    k1 = conv_ws[0].shape[1]
    if p1.shape[0] != k1:
        p1 = jnp.pad(p1, ((0, k1 - p1.shape[0]), (0, 0)))

    kernel = _make_net_kernel(S, batch, planes)
    out_t = pl.pallas_call(
        kernel,
        out_shape=jax.ShapeDtypeStruct((num_classes, batch), jnp.float32),
        in_specs=[_vmem()] * (1 + len(conv_ws) + 3),
        out_specs=_vmem(),
        compiler_params=pltpu.CompilerParams(
            vmem_limit_bytes=32 * 1024 * 1024),
    )(p1, *conv_ws, b_stack, wfc_t, bfc_t)
    # TODO(synk): at large batch sizes add a batch-tile grid axis with
    # dimension_semantics=("parallel",) (v7x megacore); pointless at B=2.
    return out_t.T                       # tiny (nc, B) -> (B, nc) outside kernel


# -----------------------------------------------------------------------------
# Deterministic synthetic parameters + host-side eval-mode BN folding.
#   BN(conv(x) + b) = conv_{w*scale}(x) + (beta + scale*(b - mean)),
#   scale = gamma / sqrt(var + eps).
# -----------------------------------------------------------------------------
def init_params(key, planes=8, num_classes=10):
    in_ch = (1,) + (planes,) * (len(_KSIZES) - 1)
    raw = []
    for k, cin in zip(_KSIZES, in_ch):
        key, kw_, kb_, kg_, kbe_, km_, kv_ = jax.random.split(key, 7)
        raw.append(dict(
            w=(0.1 * jax.random.normal(kw_, (k, k, cin, planes))).astype(jnp.float32),
            b=(0.05 * jax.random.normal(kb_, (planes,))).astype(jnp.float32),
            gamma=(1.0 + 0.1 * jax.random.normal(kg_, (planes,))).astype(jnp.float32),
            beta=(0.1 * jax.random.normal(kbe_, (planes,))).astype(jnp.float32),
            mean=(0.1 * jax.random.normal(km_, (planes,))).astype(jnp.float32),
            var=(0.5 + 0.5 * jnp.abs(jax.random.normal(kv_, (planes,)))).astype(jnp.float32),
        ))
    key, kf1, kf2 = jax.random.split(key, 3)
    wfc = (0.1 * jax.random.normal(kf1, (planes, num_classes))).astype(jnp.float32)
    bfc = (0.05 * jax.random.normal(kf2, (num_classes,))).astype(jnp.float32)
    return raw, wfc, bfc


def fold_params(raw, wfc, bfc):
    """Fold BN into conv weights and lay everything out channel-major."""
    conv_ws, shifts = [], []
    for p in raw:
        k, _, cin, cout = p['w'].shape
        scale = p['gamma'] / jnp.sqrt(p['var'] + _BN_EPS)
        w_fold = (p['w'] * scale).reshape(k * k * cin, cout)   # rows = (kh, kw, ci)
        kpad = (-w_fold.shape[0]) % 8                          # sublane-align K
        if kpad:
            w_fold = jnp.pad(w_fold, ((0, kpad), (0, 0)))
        conv_ws.append(jnp.transpose(w_fold).astype(jnp.float32))   # (Cout, K)
        shifts.append(p['beta'] + scale * (p['b'] - p['mean']))
    b_stack = jnp.concatenate(shifts).reshape(-1, 1).astype(jnp.float32)  # (L*C, 1)
    wfc_t = jnp.transpose(wfc).astype(jnp.float32)              # (nc, planes)
    bfc_t = bfc.reshape(-1, 1).astype(jnp.float32)               # (nc, 1)
    return tuple(conv_ws), b_stack, wfc_t, bfc_t


def reference_forward(x, raw, wfc, bfc):
    """Pure-JAX reference of Net.forward (eval-mode BN), f32 throughout."""
    for i, p in enumerate(raw):
        y = lax.conv_general_dilated(
            x, p['w'], window_strides=(1, 1), padding='VALID',
            dimension_numbers=('NCHW', 'HWIO', 'NCHW'),
            precision=lax.Precision.HIGHEST)
        y = y + p['b'][None, :, None, None]
        inv = p['gamma'] / jnp.sqrt(p['var'] + _BN_EPS)
        y = (y - p['mean'][None, :, None, None]) * inv[None, :, None, None] \
            + p['beta'][None, :, None, None]
        x = jnp.maximum(y, 0.0)
        if i + 1 == _POOL_AFTER:
            x = lax.reduce_window(x, -jnp.inf, lax.max,
                                  (1, 1, 2, 2), (1, 1, 2, 2), 'VALID')
    g = jnp.max(x, axis=(2, 3))                        # gmp + view -> (B, planes)
    z = jnp.dot(g, wfc, precision=lax.Precision.HIGHEST) + bfc
    return jax.nn.log_softmax(z, axis=1)


if __name__ == "__main__":
    key = jax.random.PRNGKey(0)
    k_in, k_par = jax.random.split(key)
    # rotMNIST-style input: batch=2, 1 channel, 28x28 (the conv stack ends at 1x1).
    x = jax.random.normal(k_in, (2, 1, 28, 28), dtype=jnp.float32)
    raw, wfc, bfc = init_params(k_par, planes=8, num_classes=10)
    conv_ws, b_stack, wfc_t, bfc_t = fold_params(raw, wfc, bfc)

    out = jax.block_until_ready(net_forward(x, conv_ws, b_stack, wfc_t, bfc_t))
    ref = jax.block_until_ready(reference_forward(x, raw, wfc, bfc))

    assert out.shape == (2, 10), out.shape
    assert bool(jnp.isfinite(out).all())
    err = float(jnp.max(jnp.abs(out - ref)))
    assert err < 1e-2, f"kernel/reference mismatch: max abs err {err}"
    print("KERNEL_OK")
</pallas_src>

<mosaic_0001>
module attributes {stable_mosaic.version = 11 : i64} {
  func.func @kernel(%arg0: memref<16x2048xf32, #tpu.memory_space<vmem>>, %arg1: memref<8x16xf32, #tpu.memory_space<vmem>>, %arg2: memref<8x72xf32, #tpu.memory_space<vmem>>, %arg3: memref<8x72xf32, #tpu.memory_space<vmem>>, %arg4: memref<8x72xf32, #tpu.memory_space<vmem>>, %arg5: memref<8x72xf32, #tpu.memory_space<vmem>>, %arg6: memref<8x72xf32, #tpu.memory_space<vmem>>, %arg7: memref<8x128xf32, #tpu.memory_space<vmem>>, %arg8: memref<56x1xf32, #tpu.memory_space<vmem>>, %arg9: memref<10x8xf32, #tpu.memory_space<vmem>>, %arg10: memref<10x1xf32, #tpu.memory_space<vmem>>, %arg11: memref<10x2xf32, #tpu.memory_space<vmem>>) attributes {dimension_semantics = [], scalar_prefetch = 0 : i64, scratch_operands = 0 : i64, tpu.core_type = #tpu.core_type<tc>} {
    %c0 = arith.constant 0 : index
    %c0_0 = arith.constant 0 : index
    %0 = vector.load %arg0[%c0, %c0_0] : memref<16x2048xf32, #tpu.memory_space<vmem>>, vector<16x2048xf32>
    %c0_1 = arith.constant 0 : index
    %c0_2 = arith.constant 0 : index
    %1 = vector.load %arg1[%c0_1, %c0_2] : memref<8x16xf32, #tpu.memory_space<vmem>>, vector<8x16xf32>
    %cst = arith.constant dense<0.000000e+00> : vector<8x2048xf32>
    %2 = tpu.matmul %1, %0, %cst {dimension_numbers = #tpu.dot_dimension_numbers<[1], [0], [0], [1], [0, 0, 1, 1], [], []>} : vector<8x16xf32>, vector<16x2048xf32>, vector<8x2048xf32> -> vector<8x2048xf32>
    %c0_3 = arith.constant 0 : index
    %c0_4 = arith.constant 0 : index
    %3 = vector.load %arg8[%c0_3, %c0_4] : memref<56x1xf32, #tpu.memory_space<vmem>>, vector<8x1xf32>
    %4 = vector.broadcast %3 : vector<8x1xf32> to vector<8x2048xf32>
    %5 = arith.addf %2, %4 : vector<8x2048xf32>
    %cst_5 = arith.constant 0.000000e+00 : f32
    %6 = vector.broadcast %cst_5 : f32 to vector<8x2048xf32>
    %7 = arith.maximumf %5, %6 : vector<8x2048xf32>
    %c2046_i32 = arith.constant 2046 : i32
    %8 = tpu.dynamic_rotate %7 by %c2046_i32 dim 1 : vector<8x2048xf32>, i32 -> vector<8x2048xf32>
    %c2044_i32 = arith.constant 2044 : i32
    %9 = tpu.dynamic_rotate %7 by %c2044_i32 dim 1 : vector<8x2048xf32>, i32 -> vector<8x2048xf32>
    %c1984_i32 = arith.constant 1984 : i32
    %10 = tpu.dynamic_rotate %7 by %c1984_i32 dim 1 : vector<8x2048xf32>, i32 -> vector<8x2048xf32>
    %c1982_i32 = arith.constant 1982 : i32
    %11 = tpu.dynamic_rotate %7 by %c1982_i32 dim 1 : vector<8x2048xf32>, i32 -> vector<8x2048xf32>
    %c1980_i32 = arith.constant 1980 : i32
    %12 = tpu.dynamic_rotate %7 by %c1980_i32 dim 1 : vector<8x2048xf32>, i32 -> vector<8x2048xf32>
    %c1920_i32 = arith.constant 1920 : i32
    %13 = tpu.dynamic_rotate %7 by %c1920_i32 dim 1 : vector<8x2048xf32>, i32 -> vector<8x2048xf32>
    %c1918_i32 = arith.constant 1918 : i32
    %14 = tpu.dynamic_rotate %7 by %c1918_i32 dim 1 : vector<8x2048xf32>, i32 -> vector<8x2048xf32>
    %c1916_i32 = arith.constant 1916 : i32
    %15 = tpu.dynamic_rotate %7 by %c1916_i32 dim 1 : vector<8x2048xf32>, i32 -> vector<8x2048xf32>
    %16 = tpu.concatenate %7, %8, %9, %10, %11, %12, %13, %14, %15 in 0 : vector<8x2048xf32>, vector<8x2048xf32>, vector<8x2048xf32>, vector<8x2048xf32>, vector<8x2048xf32>, vector<8x2048xf32>, vector<8x2048xf32>, vector<8x2048xf32>, vector<8x2048xf32> -> vector<72x2048xf32>
    %c0_6 = arith.constant 0 : index
    %c0_7 = arith.constant 0 : index
    %17 = vector.load %arg2[%c0_6, %c0_7] : memref<8x72xf32, #tpu.memory_space<vmem>>, vector<8x72xf32>
    %cst_8 = arith.constant dense<0.000000e+00> : vector<8x2048xf32>
    %18 = tpu.matmul %17, %16, %cst_8 {dimension_numbers = #tpu.dot_dimension_numbers<[1], [0], [0], [1], [0, 0, 1, 1], [], []>} : vector<8x72xf32>, vector<72x2048xf32>, vector<8x2048xf32> -> vector<8x2048xf32>
    %c8 = arith.constant 8 : index
    %c0_9 = arith.constant 0 : index
    %19 = vector.load %arg8[%c8, %c0_9] : memref<56x1xf32, #tpu.memory_space<vmem>>, vector<8x1xf32>
    %20 = vector.broadcast %19 : vector<8x1xf32> to vector<8x2048xf32>
    %21 = arith.addf %18, %20 : vector<8x2048xf32>
    %cst_10 = arith.constant 0.000000e+00 : f32
    %22 = vector.broadcast %cst_10 : f32 to vector<8x2048xf32>
    %23 = arith.maximumf %21, %22 : vector<8x2048xf32>
    %c2046_i32_11 = arith.constant 2046 : i32
    %24 = tpu.dynamic_rotate %23 by %c2046_i32_11 dim 1 : vector<8x2048xf32>, i32 -> vector<8x2048xf32>
    %25 = arith.maximumf %23, %24 : vector<8x2048xf32>
    %c1984_i32_12 = arith.constant 1984 : i32
    %26 = tpu.dynamic_rotate %23 by %c1984_i32_12 dim 1 : vector<8x2048xf32>, i32 -> vector<8x2048xf32>
    %c1982_i32_13 = arith.constant 1982 : i32
    %27 = tpu.dynamic_rotate %23 by %c1982_i32_13 dim 1 : vector<8x2048xf32>, i32 -> vector<8x2048xf32>
    %28 = arith.maximumf %26, %27 : vector<8x2048xf32>
    %29 = arith.maximumf %25, %28 : vector<8x2048xf32>
    %c2044_i32_14 = arith.constant 2044 : i32
    %30 = tpu.dynamic_rotate %29 by %c2044_i32_14 dim 1 : vector<8x2048xf32>, i32 -> vector<8x2048xf32>
    %c2040_i32 = arith.constant 2040 : i32
    %31 = tpu.dynamic_rotate %29 by %c2040_i32 dim 1 : vector<8x2048xf32>, i32 -> vector<8x2048xf32>
    %c1920_i32_15 = arith.constant 1920 : i32
    %32 = tpu.dynamic_rotate %29 by %c1920_i32_15 dim 1 : vector<8x2048xf32>, i32 -> vector<8x2048xf32>
    %c1916_i32_16 = arith.constant 1916 : i32
    %33 = tpu.dynamic_rotate %29 by %c1916_i32_16 dim 1 : vector<8x2048xf32>, i32 -> vector<8x2048xf32>
    %c1912_i32 = arith.constant 1912 : i32
    %34 = tpu.dynamic_rotate %29 by %c1912_i32 dim 1 : vector<8x2048xf32>, i32 -> vector<8x2048xf32>
    %c1792_i32 = arith.constant 1792 : i32
    %35 = tpu.dynamic_rotate %29 by %c1792_i32 dim 1 : vector<8x2048xf32>, i32 -> vector<8x2048xf32>
    %c1788_i32 = arith.constant 1788 : i32
    %36 = tpu.dynamic_rotate %29 by %c1788_i32 dim 1 : vector<8x2048xf32>, i32 -> vector<8x2048xf32>
    %c1784_i32 = arith.constant 1784 : i32
    %37 = tpu.dynamic_rotate %29 by %c1784_i32 dim 1 : vector<8x2048xf32>, i32 -> vector<8x2048xf32>
    %38 = tpu.concatenate %29, %30, %31, %32, %33, %34, %35, %36, %37 in 0 : vector<8x2048xf32>, vector<8x2048xf32>, vector<8x2048xf32>, vector<8x2048xf32>, vector<8x2048xf32>, vector<8x2048xf32>, vector<8x2048xf32>, vector<8x2048xf32>, vector<8x2048xf32> -> vector<72x2048xf32>
    %c0_17 = arith.constant 0 : index
    %c0_18 = arith.constant 0 : index
    %39 = vector.load %arg3[%c0_17, %c0_18] : memref<8x72xf32, #tpu.memory_space<vmem>>, vector<8x72xf32>
    %cst_19 = arith.constant dense<0.000000e+00> : vector<8x2048xf32>
    %40 = tpu.matmul %39, %38, %cst_19 {dimension_numbers = #tpu.dot_dimension_numbers<[1], [0], [0], [1], [0, 0, 1, 1], [], []>} : vector<8x72xf32>, vector<72x2048xf32>, vector<8x2048xf32> -> vector<8x2048xf32>
    %c16 = arith.constant 16 : index
    %c0_20 = arith.constant 0 : index
    %41 = vector.load %arg8[%c16, %c0_20] : memref<56x1xf32, #tpu.memory_space<vmem>>, vector<8x1xf32>
    %42 = vector.broadcast %41 : vector<8x1xf32> to vector<8x2048xf32>
    %43 = arith.addf %40, %42 : vector<8x2048xf32>
    %cst_21 = arith.constant 0.000000e+00 : f32
    %44 = vector.broadcast %cst_21 : f32 to vector<8x2048xf32>
    %45 = arith.maximumf %43, %44 : vector<8x2048xf32>
    %c2044_i32_22 = arith.constant 2044 : i32
    %46 = tpu.dynamic_rotate %45 by %c2044_i32_22 dim 1 : vector<8x2048xf32>, i32 -> vector<8x2048xf32>
    %c2040_i32_23 = arith.constant 2040 : i32
    %47 = tpu.dynamic_rotate %45 by %c2040_i32_23 dim 1 : vector<8x2048xf32>, i32 -> vector<8x2048xf32>
    %c1920_i32_24 = arith.constant 1920 : i32
    %48 = tpu.dynamic_rotate %45 by %c1920_i32_24 dim 1 : vector<8x2048xf32>, i32 -> vector<8x2048xf32>
    %c1916_i32_25 = arith.constant 1916 : i32
    %49 = tpu.dynamic_rotate %45 by %c1916_i32_25 dim 1 : vector<8x2048xf32>, i32 -> vector<8x2048xf32>
    %c1912_i32_26 = arith.constant 1912 : i32
    %50 = tpu.dynamic_rotate %45 by %c1912_i32_26 dim 1 : vector<8x2048xf32>, i32 -> vector<8x2048xf32>
    %c1792_i32_27 = arith.constant 1792 : i32
    %51 = tpu.dynamic_rotate %45 by %c1792_i32_27 dim 1 : vector<8x2048xf32>, i32 -> vector<8x2048xf32>
    %c1788_i32_28 = arith.constant 1788 : i32
    %52 = tpu.dynamic_rotate %45 by %c1788_i32_28 dim 1 : vector<8x2048xf32>, i32 -> vector<8x2048xf32>
    %c1784_i32_29 = arith.constant 1784 : i32
    %53 = tpu.dynamic_rotate %45 by %c1784_i32_29 dim 1 : vector<8x2048xf32>, i32 -> vector<8x2048xf32>
    %54 = tpu.concatenate %45, %46, %47, %48, %49, %50, %51, %52, %53 in 0 : vector<8x2048xf32>, vector<8x2048xf32>, vector<8x2048xf32>, vector<8x2048xf32>, vector<8x2048xf32>, vector<8x2048xf32>, vector<8x2048xf32>, vector<8x2048xf32>, vector<8x2048xf32> -> vector<72x2048xf32>
    %c0_30 = arith.constant 0 : index
    %c0_31 = arith.constant 0 : index
    %55 = vector.load %arg4[%c0_30, %c0_31] : memref<8x72xf32, #tpu.memory_space<vmem>>, vector<8x72xf32>
    %cst_32 = arith.constant dense<0.000000e+00> : vector<8x2048xf32>
    %56 = tpu.matmul %55, %54, %cst_32 {dimension_numbers = #tpu.dot_dimension_numbers<[1], [0], [0], [1], [0, 0, 1, 1], [], []>} : vector<8x72xf32>, vector<72x2048xf32>, vector<8x2048xf32> -> vector<8x2048xf32>
    %c24 = arith.constant 24 : index
    %c0_33 = arith.constant 0 : index
    %57 = vector.load %arg8[%c24, %c0_33] : memref<56x1xf32, #tpu.memory_space<vmem>>, vector<8x1xf32>
    %58 = vector.broadcast %57 : vector<8x1xf32> to vector<8x2048xf32>
    %59 = arith.addf %56, %58 : vector<8x2048xf32>
    %cst_34 = arith.constant 0.000000e+00 : f32
    %60 = vector.broadcast %cst_34 : f32 to vector<8x2048xf32>
    %61 = arith.maximumf %59, %60 : vector<8x2048xf32>
    %c2044_i32_35 = arith.constant 2044 : i32
    %62 = tpu.dynamic_rotate %61 by %c2044_i32_35 dim 1 : vector<8x2048xf32>, i32 -> vector<8x2048xf32>
    %c2040_i32_36 = arith.constant 2040 : i32
    %63 = tpu.dynamic_rotate %61 by %c2040_i32_36 dim 1 : vector<8x2048xf32>, i32 -> vector<8x2048xf32>
    %c1920_i32_37 = arith.constant 1920 : i32
    %64 = tpu.dynamic_rotate %61 by %c1920_i32_37 dim 1 : vector<8x2048xf32>, i32 -> vector<8x2048xf32>
    %c1916_i32_38 = arith.constant 1916 : i32
    %65 = tpu.dynamic_rotate %61 by %c1916_i32_38 dim 1 : vector<8x2048xf32>, i32 -> vector<8x2048xf32>
    %c1912_i32_39 = arith.constant 1912 : i32
    %66 = tpu.dynamic_rotate %61 by %c1912_i32_39 dim 1 : vector<8x2048xf32>, i32 -> vector<8x2048xf32>
    %c1792_i32_40 = arith.constant 1792 : i32
    %67 = tpu.dynamic_rotate %61 by %c1792_i32_40 dim 1 : vector<8x2048xf32>, i32 -> vector<8x2048xf32>
    %c1788_i32_41 = arith.constant 1788 : i32
    %68 = tpu.dynamic_rotate %61 by %c1788_i32_41 dim 1 : vector<8x2048xf32>, i32 -> vector<8x2048xf32>
    %c1784_i32_42 = arith.constant 1784 : i32
    %69 = tpu.dynamic_rotate %61 by %c1784_i32_42 dim 1 : vector<8x2048xf32>, i32 -> vector<8x2048xf32>
    %70 = tpu.concatenate %61, %62, %63, %64, %65, %66, %67, %68, %69 in 0 : vector<8x2048xf32>, vector<8x2048xf32>, vector<8x2048xf32>, vector<8x2048xf32>, vector<8x2048xf32>, vector<8x2048xf32>, vector<8x2048xf32>, vector<8x2048xf32>, vector<8x2048xf32> -> vector<72x2048xf32>
    %c0_43 = arith.constant 0 : index
    %c0_44 = arith.constant 0 : index
    %71 = vector.load %arg5[%c0_43, %c0_44] : memref<8x72xf32, #tpu.memory_space<vmem>>, vector<8x72xf32>
    %cst_45 = arith.constant dense<0.000000e+00> : vector<8x2048xf32>
    %72 = tpu.matmul %71, %70, %cst_45 {dimension_numbers = #tpu.dot_dimension_numbers<[1], [0], [0], [1], [0, 0, 1, 1], [], []>} : vector<8x72xf32>, vector<72x2048xf32>, vector<8x2048xf32> -> vector<8x2048xf32>
    %c32 = arith.constant 32 : index
    %c0_46 = arith.constant 0 : index
    %73 = vector.load %arg8[%c32, %c0_46] : memref<56x1xf32, #tpu.memory_space<vmem>>, vector<8x1xf32>
    %74 = vector.broadcast %73 : vector<8x1xf32> to vector<8x2048xf32>
    %75 = arith.addf %72, %74 : vector<8x2048xf32>
    %cst_47 = arith.constant 0.000000e+00 : f32
    %76 = vector.broadcast %cst_47 : f32 to vector<8x2048xf32>
    %77 = arith.maximumf %75, %76 : vector<8x2048xf32>
    %c2044_i32_48 = arith.constant 2044 : i32
    %78 = tpu.dynamic_rotate %77 by %c2044_i32_48 dim 1 : vector<8x2048xf32>, i32 -> vector<8x2048xf32>
    %c2040_i32_49 = arith.constant 2040 : i32
    %79 = tpu.dynamic_rotate %77 by %c2040_i32_49 dim 1 : vector<8x2048xf32>, i32 -> vector<8x2048xf32>
    %c1920_i32_50 = arith.constant 1920 : i32
    %80 = tpu.dynamic_rotate %77 by %c1920_i32_50 dim 1 : vector<8x2048xf32>, i32 -> vector<8x2048xf32>
    %c1916_i32_51 = arith.constant 1916 : i32
    %81 = tpu.dynamic_rotate %77 by %c1916_i32_51 dim 1 : vector<8x2048xf32>, i32 -> vector<8x2048xf32>
    %c1912_i32_52 = arith.constant 1912 : i32
    %82 = tpu.dynamic_rotate %77 by %c1912_i32_52 dim 1 : vector<8x2048xf32>, i32 -> vector<8x2048xf32>
    %c1792_i32_53 = arith.constant 1792 : i32
    %83 = tpu.dynamic_rotate %77 by %c1792_i32_53 dim 1 : vector<8x2048xf32>, i32 -> vector<8x2048xf32>
    %c1788_i32_54 = arith.constant 1788 : i32
    %84 = tpu.dynamic_rotate %77 by %c1788_i32_54 dim 1 : vector<8x2048xf32>, i32 -> vector<8x2048xf32>
    %c1784_i32_55 = arith.constant 1784 : i32
    %85 = tpu.dynamic_rotate %77 by %c1784_i32_55 dim 1 : vector<8x2048xf32>, i32 -> vector<8x2048xf32>
    %86 = tpu.concatenate %77, %78, %79, %80, %81, %82, %83, %84, %85 in 0 : vector<8x2048xf32>, vector<8x2048xf32>, vector<8x2048xf32>, vector<8x2048xf32>, vector<8x2048xf32>, vector<8x2048xf32>, vector<8x2048xf32>, vector<8x2048xf32>, vector<8x2048xf32> -> vector<72x2048xf32>
    %c0_56 = arith.constant 0 : index
    %c0_57 = arith.constant 0 : index
    %87 = vector.load %arg6[%c0_56, %c0_57] : memref<8x72xf32, #tpu.memory_space<vmem>>, vector<8x72xf32>
    %cst_58 = arith.constant dense<0.000000e+00> : vector<8x2048xf32>
    %88 = tpu.matmul %87, %86, %cst_58 {dimension_numbers = #tpu.dot_dimension_numbers<[1], [0], [0], [1], [0, 0, 1, 1], [], []>} : vector<8x72xf32>, vector<72x2048xf32>, vector<8x2048xf32> -> vector<8x2048xf32>
    %c40 = arith.constant 40 : index
    %c0_59 = arith.constant 0 : index
    %89 = vector.load %arg8[%c40, %c0_59] : memref<56x1xf32, #tpu.memory_space<vmem>>, vector<8x1xf32>
    %90 = vector.broadcast %89 : vector<8x1xf32> to vector<8x2048xf32>
    %91 = arith.addf %88, %90 : vector<8x2048xf32>
    %cst_60 = arith.constant 0.000000e+00 : f32
    %92 = vector.broadcast %cst_60 : f32 to vector<8x2048xf32>
    %93 = arith.maximumf %91, %92 : vector<8x2048xf32>
    %c2044_i32_61 = arith.constant 2044 : i32
    %94 = tpu.dynamic_rotate %93 by %c2044_i32_61 dim 1 : vector<8x2048xf32>, i32 -> vector<8x2048xf32>
    %c2040_i32_62 = arith.constant 2040 : i32
    %95 = tpu.dynamic_rotate %93 by %c2040_i32_62 dim 1 : vector<8x2048xf32>, i32 -> vector<8x2048xf32>
    %c2036_i32 = arith.constant 2036 : i32
    %96 = tpu.dynamic_rotate %93 by %c2036_i32 dim 1 : vector<8x2048xf32>, i32 -> vector<8x2048xf32>
    %c1920_i32_63 = arith.constant 1920 : i32
    %97 = tpu.dynamic_rotate %93 by %c1920_i32_63 dim 1 : vector<8x2048xf32>, i32 -> vector<8x2048xf32>
    %c1916_i32_64 = arith.constant 1916 : i32
    %98 = tpu.dynamic_rotate %93 by %c1916_i32_64 dim 1 : vector<8x2048xf32>, i32 -> vector<8x2048xf32>
    %c1912_i32_65 = arith.constant 1912 : i32
    %99 = tpu.dynamic_rotate %93 by %c1912_i32_65 dim 1 : vector<8x2048xf32>, i32 -> vector<8x2048xf32>
    %c1908_i32 = arith.constant 1908 : i32
    %100 = tpu.dynamic_rotate %93 by %c1908_i32 dim 1 : vector<8x2048xf32>, i32 -> vector<8x2048xf32>
    %c1792_i32_66 = arith.constant 1792 : i32
    %101 = tpu.dynamic_rotate %93 by %c1792_i32_66 dim 1 : vector<8x2048xf32>, i32 -> vector<8x2048xf32>
    %c1788_i32_67 = arith.constant 1788 : i32
    %102 = tpu.dynamic_rotate %93 by %c1788_i32_67 dim 1 : vector<8x2048xf32>, i32 -> vector<8x2048xf32>
    %c1784_i32_68 = arith.constant 1784 : i32
    %103 = tpu.dynamic_rotate %93 by %c1784_i32_68 dim 1 : vector<8x2048xf32>, i32 -> vector<8x2048xf32>
    %c1780_i32 = arith.constant 1780 : i32
    %104 = tpu.dynamic_rotate %93 by %c1780_i32 dim 1 : vector<8x2048xf32>, i32 -> vector<8x2048xf32>
    %c1664_i32 = arith.constant 1664 : i32
    %105 = tpu.dynamic_rotate %93 by %c1664_i32 dim 1 : vector<8x2048xf32>, i32 -> vector<8x2048xf32>
    %c1660_i32 = arith.constant 1660 : i32
    %106 = tpu.dynamic_rotate %93 by %c1660_i32 dim 1 : vector<8x2048xf32>, i32 -> vector<8x2048xf32>
    %c1656_i32 = arith.constant 1656 : i32
    %107 = tpu.dynamic_rotate %93 by %c1656_i32 dim 1 : vector<8x2048xf32>, i32 -> vector<8x2048xf32>
    %c1652_i32 = arith.constant 1652 : i32
    %108 = tpu.dynamic_rotate %93 by %c1652_i32 dim 1 : vector<8x2048xf32>, i32 -> vector<8x2048xf32>
    %109 = tpu.concatenate %93, %94, %95, %96, %97, %98, %99, %100, %101, %102, %103, %104, %105, %106, %107, %108 in 0 : vector<8x2048xf32>, vector<8x2048xf32>, vector<8x2048xf32>, vector<8x2048xf32>, vector<8x2048xf32>, vector<8x2048xf32>, vector<8x2048xf32>, vector<8x2048xf32>, vector<8x2048xf32>, vector<8x2048xf32>, vector<8x2048xf32>, vector<8x2048xf32>, vector<8x2048xf32>, vector<8x2048xf32>, vector<8x2048xf32>, vector<8x2048xf32> -> vector<128x2048xf32>
    %c0_69 = arith.constant 0 : index
    %c0_70 = arith.constant 0 : index
    %110 = vector.load %arg7[%c0_69, %c0_70] : memref<8x128xf32, #tpu.memory_space<vmem>>, vector<8x128xf32>
    %cst_71 = arith.constant dense<0.000000e+00> : vector<8x2048xf32>
    %111 = tpu.matmul %110, %109, %cst_71 {dimension_numbers = #tpu.dot_dimension_numbers<[1], [0], [0], [1], [0, 0, 1, 1], [], []>} : vector<8x128xf32>, vector<128x2048xf32>, vector<8x2048xf32> -> vector<8x2048xf32>
    %c48 = arith.constant 48 : index
    %c0_72 = arith.constant 0 : index
    %112 = vector.load %arg8[%c48, %c0_72] : memref<56x1xf32, #tpu.memory_space<vmem>>, vector<8x1xf32>
    %113 = vector.broadcast %112 : vector<8x1xf32> to vector<8x2048xf32>
    %114 = arith.addf %111, %113 : vector<8x2048xf32>
    %cst_73 = arith.constant 0.000000e+00 : f32
    %115 = vector.broadcast %cst_73 : f32 to vector<8x2048xf32>
    %116 = arith.maximumf %114, %115 : vector<8x2048xf32>
    %c0_74 = arith.constant 0 : index
    %c0_75 = arith.constant 0 : index
    %117 = vector.load %arg9[%c0_74, %c0_75] : memref<10x8xf32, #tpu.memory_space<vmem>>, vector<10x8xf32>
    %cst_76 = arith.constant dense<0.000000e+00> : vector<10x2048xf32>
    %118 = tpu.matmul %117, %116, %cst_76 {dimension_numbers = #tpu.dot_dimension_numbers<[1], [0], [0], [1], [0, 0, 1, 1], [], []>} : vector<10x8xf32>, vector<8x2048xf32>, vector<10x2048xf32> -> vector<10x2048xf32>
    %119 = vector.extract_strided_slice %118 {offsets = [0, 0], sizes = [10, 2], strides = [1, 1]} : vector<10x2048xf32> to vector<10x2xf32>
    %c0_77 = arith.constant 0 : index
    %c0_78 = arith.constant 0 : index
    %120 = vector.load %arg10[%c0_77, %c0_78] : memref<10x1xf32, #tpu.memory_space<vmem>>, vector<10x1xf32>
    %121 = vector.broadcast %120 : vector<10x1xf32> to vector<10x2xf32>
    %122 = arith.addf %119, %121 : vector<10x2xf32>
    %cst_79 = arith.constant dense<0xFF800000> : vector<2xf32>
    %123 = vector.multi_reduction <maximumf>, %122, %cst_79 [0] : vector<10x2xf32> to vector<2xf32>
    %124 = vector.shape_cast %123 : vector<2xf32> to vector<1x2xf32>
    %125 = vector.broadcast %124 : vector<1x2xf32> to vector<10x2xf32>
    %126 = arith.subf %122, %125 : vector<10x2xf32>
    %127 = math.exp %126 : vector<10x2xf32>
    %cst_80 = arith.constant dense<0.000000e+00> : vector<2xf32>
    %128 = vector.multi_reduction <add>, %127, %cst_80 [0] : vector<10x2xf32> to vector<2xf32>
    %129 = vector.shape_cast %128 : vector<2xf32> to vector<1x2xf32>
    %130 = math.log %129 : vector<1x2xf32>
    %131 = arith.addf %130, %124 : vector<1x2xf32>
    %132 = vector.broadcast %131 : vector<1x2xf32> to vector<10x2xf32>
    %133 = arith.subf %122, %132 : vector<10x2xf32>
    %c0_81 = arith.constant 0 : index
    %c0_82 = arith.constant 0 : index
    %134 = vector.load %arg11[%c0_81, %c0_82] : memref<10x2xf32, #tpu.memory_space<vmem>>, vector<10x2xf32>
    tpu.vector_store %arg11[%c0_81, %c0_82], %133 {strides = array<i32>} : memref<10x2xf32, #tpu.memory_space<vmem>>, vector<10x2xf32>,
    return
  }
}

</mosaic_0001>

<bundles_post_ra>
// kernel: net_forward.1
= control target key start
LH: loop header
LB: loop body
LE: loop exit
PB: predicated region body
PF: predicated region fallthrough
CT: control target
= control target key end

     0   :  { %v3128_v3 = vmov 0   ;;  %vm77_vm0 = vcmask 130048   ;;  %s3130_s25 = smov 60   ;;  %s3131_s26 = smov 124   ;;  %vm671_vm6 = vcmask 588800   ;;  %vm2403_vm9 = vcmask 64512   ;;  %s5170_s0 = inlined_call_operand.vmem [shape: f32[16,2048], index: 0, kind: input, shape index: {}]   ;;  %s5171_s1 = inlined_call_operand.vmem [shape: f32[8,16], index: 1, kind: input, shape index: {}]   ;;  %s5172_s8 = inlined_call_operand.vmem [shape: f32[56,1], index: 8, kind: input, shape index: {}]   ;;  %s5173_s2 = inlined_call_operand.vmem [shape: f32[8,72], index: 2, kind: input, shape index: {}]   ;;  %s5174_s3 = inlined_call_operand.vmem [shape: f32[8,72], index: 3, kind: input, shape index: {}]   ;;  %s5175_s4 = inlined_call_operand.vmem [shape: f32[8,72], index: 4, kind: input, shape index: {}]   ;;  %s5176_s5 = inlined_call_operand.vmem [shape: f32[8,72], index: 5, kind: input, shape index: {}]   ;;  %s5177_s6 = inlined_call_operand.vmem [shape: f32[8,72], index: 6, kind: input, shape index: {}]   ;;  %s5178_s10 = inlined_call_operand.vmem [shape: f32[10,1], index: 10, kind: input, shape index: {}]   ;;  %s5179_s7 = inlined_call_operand.vmem [shape: f32[8,128], index: 7, kind: input, shape index: {}]   ;;  %s5180_s9 = inlined_call_operand.vmem [shape: f32[10,8], index: 9, kind: input, shape index: {}]   ;;  %s5181_s11 = inlined_call_operand.vmem [shape: f32[10,2], index: 11, kind: output, shape index: {}]  }
   0x1   :  { %v54_v0 = vld [vmem:[%s5170_s0 + $0x80] sm:$0xff]  ;;  %v55_v1 = vld [vmem:[%s5170_s0 + $0x88] sm:$0xff]  ;;  %v56_v2 = vld [vmem:[%s5170_s0 + $0x90] sm:$0xff]  ;;  %2564 = vset.pattern.permute.xlu0 %v3128_v3  ;;  %2765 = vset.pattern.permute.xlu2 %v3128_v3  ;;  %s3132_s27 = smov 64   ;;  %s3133_s28 = smov 126   ;;  %vm2447_vm10 = vcmask 15360  }
   0x2   :  { %95 = vmatpush.msra.mxu0 %v54_v0  ;;  %115 = vmatpush.msra.mxu1 %v55_v1  ;;  %v60_v4 = vld [vmem:[%s5170_s0 + $0xb0] sm:$0xff]  ;;  %v38_v5 = vld [vmem:[%s5170_s0] sm:$0xff]  ;;  %v39_v6 = vld [vmem:[%s5170_s0 + $0x8] sm:$0xff]  ;;  %s3134_s13 = smov 120   ;;  %vm2449_vm11 = vcmask 9216  }
   0x3   :  { %135 = vmatpush.msra.mxu3 %v56_v2  ;;  %215 = vmatpush.msra.mxu2 %v60_v4  ;;  %v40_v7 = vld [vmem:[%s5170_s0 + $0x10] sm:$0xff]  ;;  %v3225_v9 = vld [vmem:[%s5171_s1] sm:$0xff]  ;;  %v57_v10 = vld [vmem:[%s5170_s0 + $0x98] sm:$0xff] }
   0x4   :  { %v44_v8 = vld [vmem:[%s5170_s0 + $0x30] sm:$0xff]  ;;  %96 = vmatpush.msra.mxu0 %v38_v5  ;;  %116 = vmatpush.msra.mxu1 %v39_v6  ;;  %v58_v11 = vld [vmem:[%s5170_s0 + $0xa0] sm:$0xff]  ;;  %v59_v12 = vld [vmem:[%s5170_s0 + $0xa8] sm:$0xff] }
   0x5   :  { %136 = vmatpush.msra.mxu3 %v40_v7  ;;  %216 = vmatpush.msra.mxu2 %v44_v8  ;;  %v64_v13 = vld [vmem:[%s5170_s0 + $0xd0] sm:$0xff]  ;;  %v41_v14 = vld [vmem:[%s5170_s0 + $0x18] sm:$0xff]  ;;  %v42_v15 = vld [vmem:[%s5170_s0 + $0x20] sm:$0xff] }
   0x6   :  { %2484 = vmatmul.msk.f32.vlgmr.msra.gmra.mxu0 %vm77_vm0, %v3225_v9  ;;  %2485 = vmatmul.msk.f32.vlgmr.msra.gmra.mxu1 %vm77_vm0, %v3225_v9  ;;  %v43_v16 = vld [vmem:[%s5170_s0 + $0x28] sm:$0xff]  ;;  %v48_v17 = vld [vmem:[%s5170_s0 + $0x50] sm:$0xff]  ;;  %v61_v18 = vld [vmem:[%s5170_s0 + $0xb8] sm:$0xff] }
   0x7   :  { %2486 = vmatmul.msk.f32.vlgmr.msra.gmra.mxu3 %vm77_vm0, %v3225_v9  ;;  %2490 = vmatmul.msk.f32.vlgmr.msra.gmra.mxu2 %vm77_vm0, %v3225_v9  ;;  %v62_v19 = vld [vmem:[%s5170_s0 + $0xc0] sm:$0xff]  ;;  %v63_v20 = vld [vmem:[%s5170_s0 + $0xc8] sm:$0xff]  ;;  %v68_v21 = vld [vmem:[%s5170_s0 + $0xf0] sm:$0xff] }
   0x8   :  { %155 = vmatpush.msrb.mxu3 %v57_v10  ;;  %175 = vmatpush.msrb.mxu0 %v58_v11  ;;  %v45_v22 = vld [vmem:[%s5170_s0 + $0x38] sm:$0xff]  ;;  %v46_v23 = vld [vmem:[%s5170_s0 + $0x40] sm:$0xff]  ;;  %v47_v24 = vld [vmem:[%s5170_s0 + $0x48] sm:$0xff] }
   0x9   :  { %195 = vmatpush.msrb.mxu1 %v59_v12  ;;  %295 = vmatpush.msrb.mxu2 %v64_v13  ;;  %v52_v25 = vld [vmem:[%s5170_s0 + $0x70] sm:$0xff]  ;;  %v71_v26 = vld [vmem:[%s5172_s8] sm:$0xff]  ;;  %v65_v27 = vld [vmem:[%s5170_s0 + $0xd8] sm:$0xff] }
   0xa   :  { %156 = vmatpush.msrb.mxu3 %v41_v14  ;;  %176 = vmatpush.msrb.mxu0 %v42_v15  ;;  %v66_v28 = vld [vmem:[%s5170_s0 + $0xe0] sm:$0xff]  ;;  %v67_v29 = vld [vmem:[%s5170_s0 + $0xe8] sm:$0xff]  ;;  %v49_v30 = vld [vmem:[%s5170_s0 + $0x58] sm:$0xff] }
   0xb   :  { %196 = vmatpush.msrb.mxu1 %v43_v16  ;;  %296 = vmatpush.msrb.mxu2 %v48_v17  ;;  %v50_v31 = vld [vmem:[%s5170_s0 + $0x60] sm:$0xff]  ;;  %v51_v32 = vld [vmem:[%s5170_s0 + $0x68] sm:$0xff]  ;;  %v69_v33 = vld [vmem:[%s5170_s0 + $0xf8] sm:$0xff] }
   0xc   :  { %235 = vmatpush.msra.mxu3 %v61_v18  ;;  %255 = vmatpush.msra.mxu0 %v62_v19  ;;  %v53_v34 = vld [vmem:[%s5170_s0 + $0x78] sm:$0xff]  ;;  %s3129_s0 = smov 62  }
   0xd   :  { %275 = vmatpush.msra.mxu1 %v63_v20  ;;  %375 = vmatpush.msra.mxu2 %v68_v21 }
   0xe   :  { %2488 = vmatmul.msk.f32.vlgmr.msrb.gmra.mxu0 %vm77_vm0, %v3225_v9  ;;  %2489 = vmatmul.msk.f32.vlgmr.msrb.gmra.mxu1 %vm77_vm0, %v3225_v9 }
   0xf   :  { %2487 = vmatmul.msk.f32.vlgmr.msrb.gmra.mxu3 %vm77_vm0, %v3225_v9  ;;  %2494 = vmatmul.msk.f32.vlgmr.msrb.gmra.mxu2 %vm77_vm0, %v3225_v9 }
  0x10   :  { %236 = vmatpush.msra.mxu3 %v45_v22  ;;  %256 = vmatpush.msra.mxu0 %v46_v23 }
  0x11   :  { %276 = vmatpush.msra.mxu1 %v47_v24  ;;  %376 = vmatpush.msra.mxu2 %v52_v25 }
  0x12   :  { %74 = vperm.xlu0 %2564, %v71_v26   ;;  %315 = vmatpush.msrb.mxu3 %v65_v27 }
  0x13   :  { %335 = vmatpush.msrb.mxu0 %v66_v28  ;;  %355 = vmatpush.msrb.mxu1 %v67_v29 }
  0x14   :  { %316 = vmatpush.msrb.mxu3 %v49_v30  ;;  %3121 = vset.pattern.permute.xlu1 %v3128_v3 }
  0x15   :  { %336 = vmatpush.msrb.mxu0 %v50_v31  ;;  %356 = vmatpush.msrb.mxu1 %v51_v32 }
  0x16   :  { %2492 = vmatmul.msk.f32.vlgmr.msra.gmra.mxu0 %vm77_vm0, %v3225_v9  ;;  %2493 = vmatmul.msk.f32.vlgmr.msra.gmra.mxu1 %vm77_vm0, %v3225_v9 }
  0x17   :  { %2491 = vmatmul.msk.f32.vlgmr.msra.gmra.mxu3 %vm77_vm0, %v3225_v9  ;;  %2498 = vmatmul.msk.f32.vlgmr.msra.gmra.mxu2 %vm77_vm0, %v3225_v9 }
  0x18   :  { %395 = vmatpush.msra.mxu3 %v69_v33 }
  0x1a   :  { %396 = vmatpush.msra.mxu3 %v53_v34 }
  0x1e   :  { %2496 = vmatmul.msk.f32.vlgmr.msrb.gmra.mxu0 %vm77_vm0, %v3225_v9  ;;  %2497 = vmatmul.msk.f32.vlgmr.msrb.gmra.mxu1 %vm77_vm0, %v3225_v9 }
  0x1f   :  { %2495 = vmatmul.msk.f32.vlgmr.msrb.gmra.mxu3 %vm77_vm0, %v3225_v9 }
  0x27   :  { %2499 = vmatmul.msk.f32.vlgmr.msra.gmra.mxu3 %vm77_vm0, %v3225_v9 }
  0x83   :  { %v118_v35 = vpop.f32.mrf.mxu1  ;;  %v98_v37 = vpop.f32.mrf.mxu0 }
  0x84   :  { %v3335_v36 = vpop.permute.xlu0 %74 }
  0x85   :  { %v119_v38 = vadd.f32 %v118_v35, %v3335_v36  ;;  %v99_v39 = vadd.f32 %v98_v37, %v3335_v36 }
  0x87   :  { %v3340_v42 = vmax.f32 %v119_v38, 0.0  ;;  %v3342_v43 = vmax.f32 %v99_v39, 0.0 }
  0x8a   :  { %v218_v40 = vpop.f32.mrf.mxu2  ;;  %v138_v49 = vpop.f32.mrf.mxu3 }
  0x8b   :  { %v219_v41 = vadd.f32 %v218_v40, %v3335_v36  ;;  %v198_v45 = vpop.f32.mrf.mxu1  ;;  %v178_v50 = vpop.f32.mrf.mxu0  ;;  %v139_v0 = vadd.f32 %v138_v49, %v3335_v36 }
  0x8c   :  { %v199_v48 = vadd.f32 %v198_v45, %v3335_v36  ;;  %v179_v52 = vadd.f32 %v178_v50, %v3335_v36  ;;  %v449_v50 = vlaneseq }
  0x8d   :  { %v3344_v44 = vmax.f32 %v219_v41, 0.0  ;;  %v3384_v4 = vmax.f32 %v139_v0, 0.0 }
  0x8e   :  { %v3354_v51 = vmax.f32 %v199_v48, 0.0  ;;  %v3362_v54 = vmax.f32 %v179_v52, 0.0 }
  0x8f   :  { %v2570_v46 = vpack.i.bf16 %v3344_v44, %v3340_v42  ;;  %v2575_v47 = vpack.i.bf16 %v3342_v43, %v3344_v44 }
  0x90   :  { %v2595_v53 = vpack.i.bf16 %v3340_v42, %v3354_v51  ;;  %v2610_v57 = vpack.i.bf16 %v3342_v43, %v3362_v54 }
  0x91   :  { %2571 = vrot.lane.b32.xlu1 %v2570_v46, %s3129_s0  ;;  %2566 = vrot.lane.b32.xlu0 %v2570_v46, %s3130_s25 }
  0x92   :  { %2576 = vrot.lane.b32.xlu2 %v2575_v47, %s3131_s26  ;;  %v158_v55 = vpop.f32.mrf.mxu3  ;;  %v298_v5 = vpop.f32.mrf.mxu2 }
  0x93   :  { %v159_v56 = vadd.f32 %v158_v55, %v3335_v36  ;;  %v258_v59 = vpop.f32.mrf.mxu0  ;;  %v278_v60 = vpop.f32.mrf.mxu1  ;;  %v299_v9 = vadd.f32 %v298_v5, %v3335_v36 }
  0x94   :  { %v259_v61 = vadd.f32 %v258_v59, %v3335_v36  ;;  %v279_v62 = vadd.f32 %v278_v60, %v3335_v36 }
  0x95   :  { %v3370_v58 = vmax.f32 %v159_v56, 0.0  ;;  %v3397_v11 = vmax.f32 %v299_v9, 0.0  ;;  %v3480_v56 = vand.u32 127, %v449_v50 }
  0x96   :  { %v3380_v1 = vmax.f32 %v259_v61, 0.0  ;;  %v3382_v2 = vmax.f32 %v279_v62, 0.0 }
  0x97   :  { %v2615_v63 = vpack.i.bf16 %v3362_v54, %v3370_v58  ;;  %v2625_v8 = vpack.i.bf16 %v3370_v58, %v3384_v4  ;;  %v2650_v13 = vpack.i.bf16 %v3397_v11, %v3354_v51  ;;  %vm500_vm1 = vcmp.lt.s32.totalorder %v3480_v56, 124 }
  0x98   :  { %v2655_v7 = vpack.i.bf16 %v3382_v2, %v3380_v1  ;;  %vm451_vm2 = vcmp.lt.s32.totalorder %v3480_v56, 126  ;;  %vm647_vm3 = vcmp.lt.s32.totalorder %v3480_v56, 60  ;;  %vm598_vm4 = vcmp.lt.s32.totalorder %v3480_v56, 62 }
  0x99   :  { %2581 = vrot.lane.b32.xlu0 %v2570_v46, %s3132_s27  ;;  %2586 = vrot.lane.b32.xlu1 %v2575_v47, %s3133_s28  ;;  %vm549_vm5 = vcmp.lt.s32.totalorder %v3480_v56, 64  ;;  %vm1277_vm7 = vcmp.lt.s32.totalorder %v3480_v56, 120  ;;  %vm2344_vm8 = vcmp.lt.s32.totalorder %v3480_v56, 116  ;;  %v2402_v56 = vld [vmem:[%s5180_s9 + $0x8] sm:$0x3] }
  0x9a   :  { %2596 = vrot.lane.b32.xlu2 %v2595_v53, %s3133_s28  ;;  %v238_v3 = vpop.f32.mrf.mxu3  ;;  %v378_v15 = vpop.f32.mrf.mxu2 }
  0x9b   :  { %v239_v6 = vadd.f32 %v238_v3, %v3335_v36  ;;  %v358_v16 = vpop.f32.mrf.mxu1  ;;  %v379_v17 = vadd.f32 %v378_v15, %v3335_v36  ;;  %v338_v22 = vpop.f32.mrf.mxu0 }
  0x9c   :  { %v359_v18 = vadd.f32 %v358_v16, %v3335_v36  ;;  %v339_v26 = vadd.f32 %v338_v22, %v3335_v36 }
  0x9d   :  { %v3395_v10 = vmax.f32 %v239_v6, 0.0  ;;  %v3416_v19 = vmax.f32 %v379_v17, 0.0 }
  0x9e   :  { %v3418_v20 = vmax.f32 %v359_v18, 0.0  ;;  %v3431_v28 = vmax.f32 %v339_v26, 0.0 }
  0x9f   :  { %v2670_v12 = vpack.i.bf16 %v3395_v10, %v3384_v4  ;;  %v2680_v14 = vpack.i.bf16 %v3380_v1, %v3395_v10  ;;  %v2690_v24 = vpack.i.bf16 %v3416_v19, %v3382_v2 }
  0xa0   :  { %v2695_v25 = vpack.i.bf16 %v3397_v11, %v3418_v20 }
  0xa1   :  { %2611 = vrot.lane.b32.xlu0 %v2610_v57, %s3132_s27  ;;  %2591 = vrot.lane.b32.xlu1 %v2595_v53, %s3131_s26 }
  0xa2   :  { %2601 = vrot.lane.b32.xlu2 %v2610_v57, %s3130_s25  ;;  %v318_v21 = vpop.f32.mrf.mxu3 }
  0xa3   :  { %v319_v23 = vadd.f32 %v318_v21, %v3335_v36 }
  0xa5   :  { %v3429_v27 = vmax.f32 %v319_v23, 0.0 }
  0xa7   :  { %v2705_v29 = vpack.i.bf16 %v3431_v28, %v3429_v27 }
  0xa9   :  { %2616 = vrot.lane.b32.xlu0 %v2615_v63, %s3131_s26  ;;  %2621 = vrot.lane.b32.xlu1 %v2615_v63, %s3133_s28 }
  0xaa   :  { %2606 = vrot.lane.b32.xlu2 %v2610_v57, %s3129_s0  ;;  %v398_v30 = vpop.f32.mrf.mxu3 }
  0xab   :  { %v399_v31 = vadd.f32 %v398_v30, %v3335_v36 }
  0xad   :  { %v3442_v32 = vmax.f32 %v399_v31, 0.0 }
  0xaf   :  { %v2740_v33 = vpack.i.bf16 %v3416_v19, %v3442_v32  ;;  %v2755_v35 = vpack.i.bf16 %v3418_v20, %v3442_v32 }
  0xb1   :  { %2656 = vrot.lane.b32.xlu0 %v2655_v7, %s3131_s26  ;;  %2626 = vrot.lane.b32.xlu1 %v2625_v8, %s3130_s25 }
  0xb2   :  { %2636 = vrot.lane.b32.xlu2 %v2625_v8, %s3132_s27 }
  0xb9   :  { %2671 = vrot.lane.b32.xlu0 %v2670_v12, %s3133_s28  ;;  %2631 = vrot.lane.b32.xlu1 %v2625_v8, %s3129_s0 }
  0xba   :  { %2651 = vrot.lane.b32.xlu2 %v2650_v13, %s3132_s27 }
  0xc1   :  { %2681 = vrot.lane.b32.xlu0 %v2680_v14, %s3129_s0  ;;  %2641 = vrot.lane.b32.xlu1 %v2650_v13, %s3130_s25 }
  0xc2   :  { %2666 = vrot.lane.b32.xlu2 %v2670_v12, %s3131_s26 }
  0xc9   :  { %2686 = vrot.lane.b32.xlu0 %v2680_v14, %s3132_s27  ;;  %2646 = vrot.lane.b32.xlu1 %v2650_v13, %s3129_s0 }
  0xca   :  { %2676 = vrot.lane.b32.xlu2 %v2680_v14, %s3130_s25 }
  0xd1   :  { %2691 = vrot.lane.b32.xlu0 %v2690_v24, %s3130_s25  ;;  %2661 = vrot.lane.b32.xlu1 %v2655_v7, %s3133_s28 }
  0xd2   :  { %2696 = vrot.lane.b32.xlu2 %v2695_v25, %s3131_s26 }
  0xd9   :  { %2701 = vrot.lane.b32.xlu0 %v2695_v25, %s3133_s28  ;;  %2706 = vrot.lane.b32.xlu1 %v2705_v29, %s3131_s26 }
  0xda   :  { %2711 = vrot.lane.b32.xlu2 %v2705_v29, %s3133_s28 }
  0xe1   :  { %2716 = vrot.lane.b32.xlu0 %v2705_v29, %s3130_s25  ;;  %2726 = vrot.lane.b32.xlu1 %v2690_v24, %s3132_s27 }
  0xe2   :  { %2731 = vrot.lane.b32.xlu2 %v2705_v29, %s3129_s0 }
  0xe9   :  { %2721 = vrot.lane.b32.xlu0 %v2690_v24, %s3129_s0  ;;  %2741 = vrot.lane.b32.xlu1 %v2740_v33, %s3131_s26 }
  0xea   :  { %2736 = vrot.lane.b32.xlu2 %v2705_v29, %s3132_s27 }
  0xec   :  { %v3449_v34 = vpop.permute.xlu2 %2576 }
  0xf1   :  { %2756 = vrot.lane.b32.xlu0 %v2755_v35, %s3129_s0  ;;  %2746 = vrot.lane.b32.xlu1 %v2740_v33, %s3133_s28 }
  0xf2   :  { %2751 = vrot.lane.b32.xlu2 %v2755_v35, %s3130_s25 }
  0xf4   :  { %v3456_v36 = vpop.permute.xlu2 %2596 }
  0xf5   :  { %v2598_v3 = vunpack.i.l.bf16 %v3456_v36  ;;  %v2599_v22 = vunpack.i.h.bf16 %v3456_v36 }
  0xf9   :  { %2761 = vrot.lane.b32.xlu1 %v2755_v35, %s3132_s27 }
  0xfc   :  { %v3459_v37 = vpop.permute.xlu2 %2601 }
  0xfd   :  { %v2603_v15 = vunpack.i.l.bf16 %v3459_v37 }
 0x103   :  { %v3461_v38 = vpop.permute.xlu1 %2571  ;;  %v3463_v39 = vpop.permute.xlu0 %2566 }
 0x104   :  { %v3465_v40 = vpop.permute.xlu2 %2606  ;;  %v2568_v31 = vunpack.i.l.bf16 %v3463_v39 }
 0x105   :  { %v2608_v25 = vunpack.i.l.bf16 %v3465_v40 }
 0x10b   :  { %v3467_v41 = vpop.permute.xlu0 %2581  ;;  %v3469_v45 = vpop.permute.xlu1 %2586 }
 0x10c   :  { %v3471_v46 = vpop.permute.xlu2 %2636 }
 0x10d   :  { %v2639_v33 = vunpack.i.h.bf16 %v3471_v46  ;;  %v2638_v35 = vunpack.i.l.bf16 %v3471_v46  ;;  %v2604_v46 = vunpack.i.h.bf16 %v3459_v37 }
 0x113   :  { %v3473_v47 = vpop.permute.xlu0 %2611  ;;  %v3475_v48 = vpop.permute.xlu1 %2591 }
 0x114   :  { %v3477_v49 = vpop.permute.xlu2 %2651  ;;  %v2593_v52 = vunpack.i.l.bf16 %v3475_v48  ;;  %v2594_v63 = vunpack.i.h.bf16 %v3475_v48  ;;  %v2613_v50 = vunpack.i.l.bf16 %v3473_v47  ;;  %v2569_v48 = vunpack.i.h.bf16 %v3463_v39 }
 0x115   :  { %v2574_v39 = vunpack.i.h.bf16 %v3461_v38 }
 0x11b   :  { %v2617_v53 = vpop.permute.xlu0 %2616  ;;  %v2622_v55 = vpop.permute.xlu1 %2621 }
 0x11c   :  { %v2619_v57 = vunpack.i.h.bf16 %v2617_v53  ;;  %v2618_v59 = vunpack.i.l.bf16 %v2617_v53  ;;  %v2624_v60 = vunpack.i.h.bf16 %v2622_v55  ;;  %v2623_v61 = vunpack.i.l.bf16 %v2622_v55  ;;  %v3482_v62 = vpop.permute.xlu2 %2666 }
 0x11d   :  { %v2668_v0 = vunpack.i.l.bf16 %v3482_v62 }
 0x11e   :  { %v3490_v5 = vsel %vm500_vm1, %v2618_v59, %v2619_v57  ;;  %v3496_v6 = vsel %vm500_vm1, %v2619_v57, %v2593_v52  ;;  %v3512_v9 = vsel %vm451_vm2, %v2623_v61, %v2624_v60  ;;  %v3518_v12 = vsel %vm451_vm2, %v2624_v60, %v2598_v3 }
 0x11f   :  { %v3502_v7 = vsel %vm500_vm1, %v2594_v63, %v2668_v0  ;;  %v513_v8 = vsel %vm500_vm1, %v2668_v0, %v2618_v59  ;;  %722 = vmatpush.msrb.mxu2 %v3490_v5  ;;  %742 = vmatpush.msrb.mxu3 %v3496_v6  ;;  %v2573_v60 = vunpack.i.l.bf16 %v3461_v38  ;;  %v5183_v0 = vunpack.i.h.bf16 %v3465_v40 }
 0x120   :  { %682 = vmatpush.msra.mxu0 %v3502_v7  ;;  %702 = vmatpush.msra.mxu1 %v513_v8 }
 0x121   :  { %723 = vmatpush.msrb.mxu2 %v3512_v9  ;;  %743 = vmatpush.msrb.mxu3 %v3518_v12 }
 0x123   :  { %v3522_v13 = vpop.permute.xlu0 %2656  ;;  %v2627_v14 = vpop.permute.xlu1 %2626  ;;  %724 = vmatpush.msrb.mxu2 %v3370_v58  ;;  %744 = vmatpush.msrb.mxu3 %v3362_v54 }
 0x124   :  { %v2629_v16 = vunpack.i.h.bf16 %v2627_v14  ;;  %v2628_v17 = vunpack.i.l.bf16 %v2627_v14  ;;  %v561_v14 = vsel %vm549_vm5, %v2639_v33, %v2613_v50 }
 0x126   :  { %v660_v18 = vsel %vm647_vm3, %v2628_v17, %v2629_v16  ;;  %v659_v21 = vsel %vm647_vm3, %v2629_v16, %v2603_v15  ;;  %v2583_v16 = vunpack.i.l.bf16 %v3467_v41 }
 0x127   :  { %725 = vmatpush.msrb.mxu2 %v660_v18  ;;  %745 = vmatpush.msrb.mxu3 %v659_v21  ;;  %v5182_v18 = vunpack.i.h.bf16 %v3473_v47  ;;  %v662_v21 = vsel %vm647_vm3, %v2604_v46, %v2568_v31 }
 0x12b   :  { %v3535_v23 = vpop.permute.xlu0 %2671  ;;  %v2632_v24 = vpop.permute.xlu1 %2631 }
 0x12c   :  { %v2673_v26 = vunpack.i.l.bf16 %v3535_v23  ;;  %v2634_v29 = vunpack.i.h.bf16 %v2632_v24  ;;  %v2633_v30 = vunpack.i.l.bf16 %v2632_v24  ;;  %v661_v24 = vsel %vm647_vm3, %v2568_v31, %v2628_v17 }
 0x12d   :  { %v2659_v17 = vunpack.i.h.bf16 %v3522_v13  ;;  %v2658_v31 = vunpack.i.l.bf16 %v3522_v13 }
 0x12e   :  { %v3549_v53 = vsel %vm451_vm2, %v2599_v22, %v2673_v26  ;;  %v464_v55 = vsel %vm451_vm2, %v2673_v26, %v2623_v61  ;;  %v611_v57 = vsel %vm598_vm4, %v2633_v30, %v2634_v29  ;;  %v610_v59 = vsel %vm598_vm4, %v2634_v29, %v2608_v25 }
 0x12f   :  { %683 = vmatpush.msra.mxu0 %v3549_v53  ;;  %703 = vmatpush.msra.mxu1 %v464_v55  ;;  %v562_v61 = vsel %vm549_vm5, %v2638_v35, %v2639_v33  ;;  %v3583_v33 = vpop.permute.xlu2 %2676 }
 0x130   :  { %726 = vmatpush.msrb.mxu2 %v611_v57  ;;  %746 = vmatpush.msrb.mxu3 %v610_v59  ;;  %v613_v57 = vsel %vm598_vm4, %v5183_v0, %v2573_v60  ;;  %v612_v59 = vsel %vm598_vm4, %v2573_v60, %v2633_v30  ;;  %v3604_v30 = vld [vmem:[%s5173_s2] sm:$0xff]  ;;  %v2669_v60 = vunpack.i.h.bf16 %v3482_v62  ;;  %v3623_v62 = vsel %vm500_vm1, %v2658_v31, %v2659_v17 }
 0x131   :  { %684 = vmatpush.msra.mxu0 %v3340_v42  ;;  %704 = vmatpush.msra.mxu1 %v3384_v4 }
 0x132   :  { %727 = vmatpush.msrb.mxu2 %v562_v61  ;;  %747 = vmatpush.msrb.mxu3 %v561_v14 }
 0x133   :  { %v3579_v26 = vpop.permute.xlu0 %2681  ;;  %v3581_v29 = vpop.permute.xlu1 %2641  ;;  %685 = vmatpush.msra.mxu0 %v662_v21  ;;  %705 = vmatpush.msra.mxu1 %v661_v24  ;;  %v2674_v21 = vunpack.i.h.bf16 %v3535_v23 }
 0x134   :  { %728 = vmatpush.msrb.mxu2 %v513_v8  ;;  %748 = vmatpush.msrb.mxu3 %v3490_v5  ;;  %v564_v5 = vsel %vm549_vm5, %v5182_v18, %v2583_v16  ;;  %v563_v8 = vsel %vm549_vm5, %v2583_v16, %v2638_v35  ;;  %v3617_v35 = vsel %vm500_vm1, %v2669_v60, %v2658_v31  ;;  %v2578_v16 = vunpack.i.l.bf16 %v3449_v34  ;;  %v665_v31 = vld [vmem:[%s5172_s8 + $0x8] sm:$0xff] }
 0x135   :  { %686 = vmatpush.msra.mxu0 %v613_v57  ;;  %706 = vmatpush.msra.mxu1 %v612_v59  ;;  %v2643_v23 = vunpack.i.l.bf16 %v3581_v29 }
 0x136   :  { %729 = vmatpush.msrb.mxu2 %v464_v55  ;;  %749 = vmatpush.msrb.mxu3 %v3512_v9  ;;  %v2579_v9 = vunpack.i.h.bf16 %v3449_v34  ;;  %v2589_v55 = vunpack.i.h.bf16 %v3469_v45  ;;  %v3664_v24 = vsel %vm500_vm1, %v2578_v16, %v2669_v60 }
 0x137   :  { %687 = vmatpush.msra.mxu0 %v564_v5  ;;  %707 = vmatpush.msra.mxu1 %v563_v8  ;;  %v2653_v5 = vunpack.i.l.bf16 %v3477_v49  ;;  %v658_v8 = vsel %vm647_vm3, %v2603_v15, %v2643_v23  ;;  %v657_v60 = vsel %vm647_vm3, %v2643_v23, %v2569_v48  ;;  %v2584_v15 = vunpack.i.h.bf16 %v3467_v41 }
 0x138   :  { %730 = vmatpush.msrb.mxu2 %v3384_v4  ;;  %750 = vmatpush.msrb.mxu3 %v3370_v58  ;;  %v3633_v58 = vsel %vm500_vm1, %v2579_v9, %v2594_v63  ;;  %v3647_v14 = vsel %vm451_vm2, %v2589_v55, %v2599_v22  ;;  %v2588_v63 = vunpack.i.l.bf16 %v3469_v45  ;;  %v510_v22 = vsel %vm500_vm1, %v2593_v52, %v2578_v16 }
 0x139   :  { %2502 = vmatmul.msk.f32.vlgmr.msrb.gmra.mxu2 %vm671_vm6, %v3604_v30  ;;  %2503 = vmatmul.msk.f32.vlgmr.msrb.gmra.mxu3 %vm671_vm6, %v3604_v30  ;;  %v2679_v16 = vunpack.i.h.bf16 %v3583_v33  ;;  %v560_v41 = vsel %vm549_vm5, %v2613_v50, %v2653_v5 }
 0x13a   :  { %802 = vmatpush.msra.mxu2 %v3617_v35  ;;  %822 = vmatpush.msra.mxu3 %v3623_v62 }
 0x13b   :  { %688 = vmatpush.msra.mxu0 %v3633_v58  ;;  %708 = vmatpush.msra.mxu1 %v3502_v7  ;;  %v3637_v4 = vpop.permute.xlu0 %2686  ;;  %v3639_v61 = vpop.permute.xlu1 %2646 }
 0x13c   :  { %v3654_v7 = vpop.permute.xlu2 %2696  ;;  %v2648_v36 = vunpack.i.l.bf16 %v3639_v61  ;;  %668 = vperm.xlu2 %2765, %v665_v31  }
 0x13d   :  { %689 = vmatpush.msra.mxu0 %v3647_v14  ;;  %709 = vmatpush.msra.mxu1 %v3549_v53  ;;  %v461_v53 = vsel %vm451_vm2, %v2598_v3, %v2588_v63 }
 0x13e   :  { %v609_v23 = vsel %vm598_vm4, %v2608_v25, %v2648_v36  ;;  %v608_v31 = vsel %vm598_vm4, %v2648_v36, %v2574_v39  ;;  %v559_v25 = vsel %vm549_vm5, %v2653_v5, %v2584_v15  ;;  %v2689_v36 = vunpack.i.h.bf16 %v3637_v4 }
 0x13f   :  { %690 = vmatpush.msra.mxu0 %v3342_v43  ;;  %710 = vmatpush.msra.mxu1 %v3340_v42  ;;  %v3674_v42 = vsel %vm451_vm2, %v2588_v63, %v2674_v21  ;;  %v2678_v63 = vunpack.i.l.bf16 %v3583_v33 }
 0x140   :  { %2500 = vmatmul.msk.f32.vlgmr.msra.gmra.mxu0 %vm671_vm6, %v3604_v30  ;;  %2501 = vmatmul.msk.f32.vlgmr.msra.gmra.mxu1 %vm671_vm6, %v3604_v30 }
 0x141   :  { %762 = vmatpush.msrb.mxu0 %v510_v22  ;;  %782 = vmatpush.msrb.mxu1 %v3664_v24  ;;  %v655_v50 = vsel %vm647_vm3, %v2678_v63, %v2679_v16 }
 0x143   :  { %763 = vmatpush.msrb.mxu0 %v461_v53  ;;  %783 = vmatpush.msrb.mxu1 %v3674_v42  ;;  %v3683_v52 = vpop.permute.xlu0 %2691  ;;  %v3685_v3 = vpop.permute.xlu1 %2661 }
 0x144   :  { %v2664_v57 = vunpack.i.h.bf16 %v3685_v3  ;;  %v2663_v59 = vunpack.i.l.bf16 %v3685_v3  ;;  %v2698_v3 = vunpack.i.l.bf16 %v3654_v7 }
 0x145   :  { %764 = vmatpush.msrb.mxu0 %v3354_v51  ;;  %784 = vmatpush.msrb.mxu1 %v3344_v44 }
 0x146   :  { %v459_v38 = vsel %vm451_vm2, %v2674_v21, %v2663_v59  ;;  %v3710_v18 = vsel %vm451_vm2, %v2663_v59, %v2664_v57  ;;  %v2684_v21 = vunpack.i.h.bf16 %v3579_v26  ;;  %v2688_v59 = vunpack.i.l.bf16 %v3637_v4 }
 0x147   :  { %765 = vmatpush.msrb.mxu0 %v658_v8  ;;  %785 = vmatpush.msrb.mxu1 %v657_v60  ;;  %v2683_v8 = vunpack.i.l.bf16 %v3579_v26  ;;  %v3722_v60 = vpop.permute.xlu2 %2711 }
 0x148   :  { %803 = vmatpush.msra.mxu2 %v459_v38  ;;  %823 = vmatpush.msra.mxu3 %v3710_v18 }
 0x149   :  { %766 = vmatpush.msrb.mxu0 %v609_v23  ;;  %786 = vmatpush.msrb.mxu1 %v608_v31  ;;  %v656_v23 = vsel %vm647_vm3, %v2569_v48, %v2678_v63  ;;  %v606_v48 = vsel %vm598_vm4, %v2683_v8, %v2684_v21 }
 0x14a   :  { %804 = vmatpush.msra.mxu2 %v3395_v10  ;;  %824 = vmatpush.msra.mxu3 %v3380_v1 }
 0x14b   :  { %767 = vmatpush.msrb.mxu0 %v560_v41  ;;  %787 = vmatpush.msrb.mxu1 %v559_v25  ;;  %v3740_v31 = vpop.permute.xlu0 %2701  ;;  %v2707_v5 = vpop.permute.xlu1 %2706  ;;  %v607_v41 = vsel %vm598_vm4, %v2574_v39, %v2683_v8  ;;  %v2699_v25 = vunpack.i.h.bf16 %v3654_v7 }
 0x14c   :  { %805 = vmatpush.msra.mxu2 %v656_v23  ;;  %825 = vmatpush.msra.mxu3 %v655_v50  ;;  %v2708_v0 = vunpack.i.l.bf16 %v2707_v5  ;;  %v2704_v39 = vunpack.i.h.bf16 %v3740_v31  ;;  %v2649_v50 = vunpack.i.h.bf16 %v3639_v61 }
 0x14d   :  { %768 = vmatpush.msrb.mxu0 %v3496_v6  ;;  %788 = vmatpush.msrb.mxu1 %v510_v22  ;;  %v558_v6 = vsel %vm549_vm5, %v2584_v15, %v2688_v59  ;;  %v557_v22 = vsel %vm549_vm5, %v2688_v59, %v2689_v36  ;;  %v2703_v59 = vunpack.i.l.bf16 %v3740_v31 }
 0x14e   :  { %806 = vmatpush.msra.mxu2 %v607_v41  ;;  %826 = vmatpush.msra.mxu3 %v606_v48  ;;  %v3760_v63 = vsel %vm500_vm1, %v2699_v25, %v2708_v0 }
 0x14f   :  { %769 = vmatpush.msrb.mxu0 %v3518_v12  ;;  %789 = vmatpush.msrb.mxu1 %v461_v53  ;;  %v2713_v12 = vunpack.i.l.bf16 %v3722_v60  ;;  %v3773_v53 = vsel %vm500_vm1, %v2659_v17, %v2699_v25  ;;  %v3775_v15 = vpop.permute.xlu2 %2731 }
 0x150   :  { %807 = vmatpush.msra.mxu2 %v558_v6  ;;  %827 = vmatpush.msra.mxu3 %v557_v22  ;;  %v2734_v25 = vunpack.i.h.bf16 %v3775_v15  ;;  %v2733_v6 = vunpack.i.l.bf16 %v3775_v15  ;;  %v2654_v22 = vunpack.i.h.bf16 %v3477_v49 }
 0x151   :  { %770 = vmatpush.msrb.mxu0 %v3362_v54  ;;  %790 = vmatpush.msrb.mxu1 %v3354_v51  ;;  %v2693_v51 = vunpack.i.l.bf16 %v3683_v52  ;;  %v3786_v54 = vsel %vm451_vm2, %v2664_v57, %v2704_v39  ;;  %v3790_v13 = vsel %vm451_vm2, %v2704_v39, %v2713_v12  ;;  %v2714_v57 = vunpack.i.h.bf16 %v3722_v60 }
 0x152   :  { %2504 = vmatmul.msk.f32.vlgmr.msrb.gmra.mxu0 %vm671_vm6, %v3604_v30  ;;  %2505 = vmatmul.msk.f32.vlgmr.msrb.gmra.mxu1 %vm671_vm6, %v3604_v30 }
 0x153   :  { %842 = vmatpush.msra.mxu0 %v3773_v53  ;;  %862 = vmatpush.msra.mxu1 %v3760_v63  ;;  %v3792_v17 = vpop.permute.xlu0 %2716  ;;  %v3794_v8 = vpop.permute.xlu1 %2726 }
 0x154   :  { %808 = vmatpush.msra.mxu2 %v3664_v24  ;;  %828 = vmatpush.msra.mxu3 %v3617_v35  ;;  %v2644_v35 = vunpack.i.h.bf16 %v3581_v29  ;;  %v2709_v24 = vunpack.i.h.bf16 %v2707_v5  ;;  %v654_v29 = vsel %vm647_vm3, %v2679_v16, %v2693_v51  ;;  %v2719_v33 = vunpack.i.h.bf16 %v3792_v17 }
 0x155   :  { %843 = vmatpush.msra.mxu0 %v3786_v54  ;;  %863 = vmatpush.msra.mxu1 %v3790_v13  ;;  %v2718_v16 = vunpack.i.l.bf16 %v3792_v17  ;;  %v2728_v41 = vunpack.i.l.bf16 %v3794_v8 }
 0x156   :  { %809 = vmatpush.msra.mxu2 %v3674_v42  ;;  %829 = vmatpush.msra.mxu3 %v459_v38  ;;  %v653_v42 = vsel %vm647_vm3, %v2693_v51, %v2644_v35  ;;  %v455_v38 = vsel %vm451_vm2, %v2713_v12, %v2714_v57 }
 0x157   :  { %844 = vmatpush.msra.mxu0 %v3382_v2  ;;  %864 = vmatpush.msra.mxu1 %v3397_v11  ;;  %v3841_v5 = vpop.permute.xlu2 %2736  ;;  %v651_v49 = vsel %vm647_vm3, %v2718_v16, %v2719_v33  ;;  %v556_v26 = vsel %vm549_vm5, %v2689_v36, %v2728_v41 }
 0x158   :  { %810 = vmatpush.msra.mxu2 %v3344_v44  ;;  %830 = vmatpush.msra.mxu3 %v3395_v10  ;;  %v504_v44 = vsel %vm500_vm1, %v2708_v0, %v2709_v24  ;;  %v3823_v10 = vsel %vm500_vm1, %v2709_v24, %v2698_v3  ;;  %v3834_v0 = vsel %vm451_vm2, %v2714_v57, %v2703_v59  ;;  %v2739_v12 = vunpack.i.h.bf16 %v3841_v5 }
 0x159   :  { %845 = vmatpush.msra.mxu0 %v654_v29  ;;  %865 = vmatpush.msra.mxu1 %v653_v42  ;;  %v2738_v51 = vunpack.i.l.bf16 %v3841_v5  ;;  %v652_v24 = vsel %vm647_vm3, %v2644_v35, %v2718_v16  ;;  %v603_v35 = vsel %vm598_vm4, %v2649_v50, %v2733_v6  ;;  %v602_v57 = vsel %vm598_vm4, %v2733_v6, %v2734_v25 }
 0x15a   :  { %2506 = vmatmul.msk.f32.vlgmr.msra.gmra.mxu2 %vm671_vm6, %v3604_v30  ;;  %2507 = vmatmul.msk.f32.vlgmr.msra.gmra.mxu3 %vm671_vm6, %v3604_v30 }
 0x15b   :  { %882 = vmatpush.msrb.mxu2 %v504_v44  ;;  %902 = vmatpush.msrb.mxu3 %v3823_v10  ;;  %v3836_v60 = vpop.permute.xlu0 %2721  ;;  %v3838_v23 = vpop.permute.xlu1 %2741  ;;  %v554_v4 = vsel %vm549_vm5, %v2654_v22, %v2738_v51  ;;  %v553_v36 = vsel %vm549_vm5, %v2738_v51, %v2739_v12 }
 0x15c   :  { %v2723_v48 = vunpack.i.l.bf16 %v3836_v60  ;;  %v2743_v42 = vunpack.i.l.bf16 %v3838_v23 }
 0x15d   :  { %883 = vmatpush.msrb.mxu2 %v455_v38  ;;  %903 = vmatpush.msrb.mxu3 %v3834_v0 }
 0x15e   :  { %v605_v61 = vsel %vm598_vm4, %v2684_v21, %v2723_v48  ;;  %v604_v39 = vsel %vm598_vm4, %v2723_v48, %v2649_v50  ;;  %v555_v21 = vsel %vm549_vm5, %v2728_v41, %v2654_v22 }
 0x15f   :  { %884 = vmatpush.msrb.mxu2 %v3429_v27  ;;  %904 = vmatpush.msrb.mxu3 %v3431_v28 }
 0x160   :  { %846 = vmatpush.msra.mxu0 %v605_v61  ;;  %866 = vmatpush.msra.mxu1 %v604_v39 }
 0x161   :  { %885 = vmatpush.msrb.mxu2 %v652_v24  ;;  %905 = vmatpush.msrb.mxu3 %v651_v49 }
 0x162   :  { %847 = vmatpush.msra.mxu0 %v556_v26  ;;  %867 = vmatpush.msra.mxu1 %v555_v21 }
 0x163   :  { %886 = vmatpush.msrb.mxu2 %v603_v35  ;;  %906 = vmatpush.msrb.mxu3 %v602_v57  ;;  %v2747_v29 = vpop.permute.xlu1 %2746 }
 0x164   :  { %848 = vmatpush.msra.mxu0 %v3623_v62  ;;  %868 = vmatpush.msra.mxu1 %v3773_v53  ;;  %v2744_v62 = vunpack.i.h.bf16 %v3838_v23  ;;  %v2748_v53 = vunpack.i.l.bf16 %v2747_v29 }
 0x165   :  { %887 = vmatpush.msrb.mxu2 %v554_v4  ;;  %907 = vmatpush.msrb.mxu3 %v553_v36 }
 0x166   :  { %849 = vmatpush.msra.mxu0 %v3710_v18  ;;  %869 = vmatpush.msra.mxu1 %v3786_v54  ;;  %v2752_v18 = vpop.permute.xlu2 %2751  ;;  %v467_v34 = vsel %vm451_vm2, %v2748_v53, %v2589_v55  ;;  %v2724_v55 = vunpack.i.h.bf16 %v3836_v60 }
 0x167   :  { %888 = vmatpush.msrb.mxu2 %v3760_v63  ;;  %908 = vmatpush.msrb.mxu3 %v504_v44  ;;  %v2749_v63 = vunpack.i.h.bf16 %v2747_v29  ;;  %v2753_v54 = vunpack.i.l.bf16 %v2752_v18 }
 0x168   :  { %850 = vmatpush.msra.mxu0 %v3380_v1  ;;  %870 = vmatpush.msra.mxu1 %v3382_v2  ;;  %v516_v1 = vsel %vm500_vm1, %v2743_v42, %v2579_v9  ;;  %v2757_v2 = vpop.permute.xlu0 %2756  ;;  %v2754_v9 = vunpack.i.h.bf16 %v2752_v18 }
 0x169   :  { %889 = vmatpush.msrb.mxu2 %v3790_v13  ;;  %909 = vmatpush.msrb.mxu3 %v455_v38  ;;  %v452_v7 = vsel %vm451_vm2, %v2749_v63, %v2748_v53  ;;  %v2758_v44 = vunpack.i.l.bf16 %v2757_v2  ;;  %v2759_v45 = vunpack.i.h.bf16 %v2757_v2  ;;  %v2729_v38 = vunpack.i.h.bf16 %v3794_v8 }
 0x16a   :  { %2508 = vmatmul.msk.f32.vlgmr.msra.gmra.mxu0 %vm671_vm6, %v3604_v30  ;;  %2509 = vmatmul.msk.f32.vlgmr.msra.gmra.mxu1 %vm671_vm6, %v3604_v30 }
 0x16b   :  { %890 = vmatpush.msrb.mxu2 %v3397_v11  ;;  %910 = vmatpush.msrb.mxu3 %v3429_v27  ;;  %v502_v11 = vsel %vm500_vm1, %v2698_v3, %v2744_v62  ;;  %v501_v27 = vsel %vm500_vm1, %v2744_v62, %v2743_v42  ;;  %v2762_v13 = vpop.permute.xlu1 %2761  ;;  %v2694_v3 = vunpack.i.h.bf16 %v3683_v52  ;;  %v663_v52 = vsel %vm647_vm3, %v2753_v54, %v2604_v46 }
 0x16c   :  { %2510 = vmatmul.msk.f32.vlgmr.msrb.gmra.mxu2 %vm671_vm6, %v3604_v30  ;;  %2511 = vmatmul.msk.f32.vlgmr.msrb.gmra.mxu3 %vm671_vm6, %v3604_v30  ;;  %v599_v37 = vsel %vm598_vm4, %v2724_v55, %v2758_v44  ;;  %v5184_v46 = vunpack.i.h.bf16 %v3465_v40  ;;  %v601_v17 = vsel %vm598_vm4, %v2734_v25, %v2759_v45  ;;  %v600_v8 = vsel %vm598_vm4, %v2759_v45, %v2724_v55 }
 0x16d   :  { %962 = vmatpush.msra.mxu2 %v516_v1  ;;  %982 = vmatpush.msra.mxu3 %v3633_v58  ;;  %v453_v58 = vsel %vm451_vm2, %v2703_v59, %v2749_v63  ;;  %v648_v31 = vsel %vm647_vm3, %v2694_v3, %v2753_v54  ;;  %v2764_v59 = vunpack.i.h.bf16 %v2762_v13  ;;  %v649_v16 = vsel %vm647_vm3, %v2754_v9, %v2694_v3 }
 0x16e   :  { %922 = vmatpush.msrb.mxu0 %v502_v11  ;;  %942 = vmatpush.msrb.mxu1 %v501_v27  ;;  %v614_v60 = vsel %vm598_vm4, %v2758_v44, %v5184_v46  ;;  %v5185_v40 = vunpack.i.h.bf16 %v3473_v47 }
 0x16f   :  { %963 = vmatpush.msra.mxu2 %v467_v34  ;;  %983 = vmatpush.msra.mxu3 %v3647_v14  ;;  %v2763_v14 = vunpack.i.l.bf16 %v2762_v13  ;;  %v552_v15 = vsel %vm549_vm5, %v2739_v12, %v2764_v59  ;;  %v551_v50 = vsel %vm549_vm5, %v2764_v59, %v2729_v38 }
 0x170   :  { %923 = vmatpush.msrb.mxu0 %v453_v58  ;;  %943 = vmatpush.msrb.mxu1 %v452_v7 }
 0x171   :  { %964 = vmatpush.msra.mxu2 %v3442_v32  ;;  %984 = vmatpush.msra.mxu3 %v3342_v43  ;;  %v650_v43 = vsel %vm647_vm3, %v2719_v33, %v2754_v9  ;;  %v550_v33 = vsel %vm549_vm5, %v2729_v38, %v2763_v14  ;;  %v565_v23 = vsel %vm549_vm5, %v2763_v14, %v5185_v40 }
 0x172   :  { %924 = vmatpush.msrb.mxu0 %v3418_v20  ;;  %944 = vmatpush.msrb.mxu1 %v3416_v19 }
 0x173   :  { %965 = vmatpush.msra.mxu2 %v648_v31  ;;  %985 = vmatpush.msra.mxu3 %v663_v52 }
 0x174   :  { %925 = vmatpush.msrb.mxu0 %v650_v43  ;;  %945 = vmatpush.msrb.mxu1 %v649_v16 }
 0x175   :  { %966 = vmatpush.msra.mxu2 %v599_v37  ;;  %986 = vmatpush.msra.mxu3 %v614_v60 }
 0x176   :  { %926 = vmatpush.msrb.mxu0 %v601_v17  ;;  %946 = vmatpush.msrb.mxu1 %v600_v8 }
 0x177   :  { %967 = vmatpush.msra.mxu2 %v550_v33  ;;  %987 = vmatpush.msra.mxu3 %v565_v23 }
 0x178   :  { %927 = vmatpush.msrb.mxu0 %v552_v15  ;;  %947 = vmatpush.msrb.mxu1 %v551_v50 }
 0x179   :  { %968 = vmatpush.msra.mxu2 %v501_v27  ;;  %988 = vmatpush.msra.mxu3 %v516_v1 }
 0x17a   :  { %928 = vmatpush.msrb.mxu0 %v3823_v10  ;;  %948 = vmatpush.msrb.mxu1 %v502_v11 }
 0x17b   :  { %969 = vmatpush.msra.mxu2 %v452_v7  ;;  %989 = vmatpush.msra.mxu3 %v467_v34 }
 0x17c   :  { %929 = vmatpush.msrb.mxu0 %v3834_v0  ;;  %949 = vmatpush.msrb.mxu1 %v453_v58 }
 0x17d   :  { %970 = vmatpush.msra.mxu2 %v3416_v19  ;;  %990 = vmatpush.msra.mxu3 %v3442_v32 }
 0x17e   :  { %930 = vmatpush.msrb.mxu0 %v3431_v28  ;;  %950 = vmatpush.msrb.mxu1 %v3418_v20 }
 0x17f   :  { %2514 = vmatmul.msk.f32.vlgmr.msra.gmra.mxu2 %vm671_vm6, %v3604_v30  ;;  %2515 = vmatmul.msk.f32.vlgmr.msra.gmra.mxu3 %vm671_vm6, %v3604_v30 }
 0x180   :  { %2512 = vmatmul.msk.f32.vlgmr.msrb.gmra.mxu0 %vm671_vm6, %v3604_v30  ;;  %2513 = vmatmul.msk.f32.vlgmr.msrb.gmra.mxu1 %vm671_vm6, %v3604_v30 }
 0x196   :  { %v3982_v47 = vpop.permute.xlu2 %668 }
 0x1bc   :  { %v732_v19 = vpop.f32.mrf.mxu2  ;;  %v752_v32 = vpop.f32.mrf.mxu3 }
 0x1bd   :  { %v3985_v28 = vadd.f32 %v732_v19, %v3982_v47  ;;  %v3988_v20 = vadd.f32 %v752_v32, %v3982_v47  ;;  %v692_v30 = vpop.f32.mrf.mxu0  ;;  %v712_v41 = vpop.f32.mrf.mxu1 }
 0x1be   :  { %v4015_v51 = vadd.f32 %v712_v41, %v3982_v47  ;;  %v4045_v1 = vadd.f32 %v692_v30, %v3982_v47 }
 0x1bf   :  { %v997_v10 = vmax.f32 %v3985_v28, 0.0  ;;  %v998_v0 = vmax.f32 %v3988_v20, 0.0 }
 0x1c0   :  { %v996_v35 = vmax.f32 %v4015_v51, 0.0  ;;  %v995_v54 = vmax.f32 %v4045_v1, 0.0 }
 0x1c1   :  { %v2776_v5 = vpack.i.bf16 %v998_v0, %v997_v10 }
 0x1c3   :  { %2777 = vrot.lane.b32.xlu1 %v2776_v5, %s3129_s0  ;;  %2767 = vrot.lane.b32.xlu0 %v2776_v5, %s3133_s28 }
 0x1c4   :  { %2772 = vrot.lane.b32.xlu2 %v2776_v5, %s3132_s27 }
 0x1cf   :  { %v772_v48 = vpop.f32.mrf.mxu0  ;;  %v792_v25 = vpop.f32.mrf.mxu1 }
 0x1d0   :  { %v4000_v6 = vadd.f32 %v772_v48, %v3982_v47  ;;  %v4003_v22 = vadd.f32 %v792_v25, %v3982_v47 }
 0x1d2   :  { %v999_v61 = vmax.f32 %v4000_v6, 0.0  ;;  %v1000_v39 = vmax.f32 %v4003_v22, 0.0 }
 0x1d4   :  { %v2786_v12 = vpack.i.bf16 %v1000_v39, %v999_v61 }
 0x1d6   :  { %2787 = vrot.lane.b32.xlu0 %v2786_v12, %s3132_s27  ;;  %2782 = vrot.lane.b32.xlu1 %v2786_v12, %s3133_s28 }
 0x1d7   :  { %2792 = vrot.lane.b32.xlu2 %v2786_v12, %s3129_s0 }
 0x1dd   :  { %v812_v49 = vpop.f32.mrf.mxu2  ;;  %v832_v21 = vpop.f32.mrf.mxu3 }
 0x1de   :  { %v4023_v4 = vadd.f32 %v812_v49, %v3982_v47  ;;  %v4026_v36 = vadd.f32 %v832_v21, %v3982_v47 }
 0x1e0   :  { %v1001_v42 = vmax.f32 %v4023_v4, 0.0  ;;  %v1002_v62 = vmax.f32 %v4026_v36, 0.0 }
 0x1e2   :  { %v2821_v63 = vpack.i.bf16 %v1002_v62, %v1001_v42 }
 0x1e7   :  { %v852_v24 = vpop.f32.mrf.mxu0  ;;  %v872_v53 = vpop.f32.mrf.mxu1 }
 0x1e8   :  { %v4018_v26 = vadd.f32 %v852_v24, %v3982_v47  ;;  %v4038_v18 = vadd.f32 %v872_v53, %v3982_v47 }
 0x1ea   :  { %v1003_v57 = vmax.f32 %v4018_v26, 0.0  ;;  %v1004_v2 = vmax.f32 %v4038_v18, 0.0 }
 0x1ec   :  { %v2806_v29 = vpack.i.bf16 %v1003_v57, %v996_v35  ;;  %v2831_v58 = vpack.i.bf16 %v1004_v2, %v995_v54 }
 0x1ee   :  { %2807 = vrot.lane.b32.xlu2 %v2806_v29, %s3129_s0  ;;  %2797 = vrot.lane.b32.xlu0 %v2806_v29, %s3133_s28 }
 0x1ef   :  { %2802 = vrot.lane.b32.xlu1 %v2806_v29, %s3132_s27  ;;  %v892_v11 = vpop.f32.mrf.mxu2  ;;  %v912_v27 = vpop.f32.mrf.mxu3 }
 0x1f0   :  { %v4053_v34 = vadd.f32 %v892_v11, %v3982_v47  ;;  %v4056_v9 = vadd.f32 %v912_v27, %v3982_v47 }
 0x1f2   :  { %v1005_v7 = vmax.f32 %v4053_v34, 0.0  ;;  %v1006_v13 = vmax.f32 %v4056_v9, 0.0 }
 0x1f4   :  { %v2851_v14 = vpack.i.bf16 %v1006_v13, %v1005_v7 }
 0x1f6   :  { %2822 = vrot.lane.b32.xlu2 %v2821_v63, %s3129_s0  ;;  %2812 = vrot.lane.b32.xlu0 %v2821_v63, %s3133_s28 }
 0x1f7   :  { %2817 = vrot.lane.b32.xlu1 %v2821_v63, %s3132_s27 }
 0x1fd   :  { %v932_v3 = vpop.f32.mrf.mxu0  ;;  %v952_v44 = vpop.f32.mrf.mxu1 }
 0x1fe   :  { %2832 = vrot.lane.b32.xlu2 %v2831_v58, %s3132_s27  ;;  %2827 = vrot.lane.b32.xlu0 %v2831_v58, %s3133_s28  ;;  %v4068_v45 = vadd.f32 %v932_v3, %v3982_v47  ;;  %v4071_v55 = vadd.f32 %v952_v44, %v3982_v47 }
 0x1ff   :  { %2837 = vrot.lane.b32.xlu1 %v2831_v58, %s3129_s0 }
 0x200   :  { %v1007_v31 = vmax.f32 %v4068_v45, 0.0  ;;  %v1008_v52 = vmax.f32 %v4071_v55, 0.0 }
 0x202   :  { %v972_v59 = vpop.f32.mrf.mxu2  ;;  %v992_v43 = vpop.f32.mrf.mxu3  ;;  %v2866_v37 = vpack.i.bf16 %v1008_v52, %v1007_v31 }
 0x203   :  { %v4083_v16 = vadd.f32 %v972_v59, %v3982_v47  ;;  %v4086_v38 = vadd.f32 %v992_v43, %v3982_v47 }
 0x205   :  { %v1009_v46 = vmax.f32 %v4083_v16, 0.0  ;;  %v1010_v60 = vmax.f32 %v4086_v38, 0.0 }
 0x206   :  { %2852 = vrot.lane.b32.xlu2 %v2851_v14, %s3129_s0  ;;  %2847 = vrot.lane.b32.xlu0 %v2851_v14, %s3132_s27 }
 0x207   :  { %2842 = vrot.lane.b32.xlu1 %v2851_v14, %s3133_s28  ;;  %v2881_v17 = vpack.i.bf16 %v1010_v60, %v1009_v46 }
 0x20e   :  { %2867 = vrot.lane.b32.xlu2 %v2866_v37, %s3129_s0  ;;  %2857 = vrot.lane.b32.xlu0 %v2866_v37, %s3133_s28 }
 0x20f   :  { %2862 = vrot.lane.b32.xlu1 %v2866_v37, %s3132_s27 }
 0x216   :  { %2882 = vrot.lane.b32.xlu2 %v2881_v17, %s3129_s0  ;;  %2872 = vrot.lane.b32.xlu0 %v2881_v17, %s3133_s28 }
 0x217   :  { %2877 = vrot.lane.b32.xlu1 %v2881_v17, %s3132_s27 }
 0x21e   :  { %v4104_v8 = vpop.permute.xlu2 %2772 }
 0x21f   :  { %v2775_v23 = vunpack.i.h.bf16 %v4104_v8  ;;  %v2774_v15 = vunpack.i.l.bf16 %v4104_v8 }
 0x221   :  { %v1119_v30 = vsel %vm549_vm5, %v2774_v15, %v2775_v23 }
 0x231   :  { %v2793_v5 = vpop.permute.xlu2 %2792 }
 0x232   :  { %v2794_v25 = vunpack.i.l.bf16 %v2793_v5  ;;  %v2795_v17 = vunpack.i.h.bf16 %v2793_v5 }
 0x235   :  { %v2778_v33 = vpop.permute.xlu1 %2777  ;;  %v4106_v40 = vpop.permute.xlu0 %2767 }
 0x236   :  { %v2780_v50 = vunpack.i.h.bf16 %v2778_v33  ;;  %v2779_v47 = vunpack.i.l.bf16 %v2778_v33  ;;  %v2770_v19 = vunpack.i.h.bf16 %v4106_v40  ;;  %v2769_v32 = vunpack.i.l.bf16 %v4106_v40 }
 0x238   :  { %v1167_v41 = vsel %vm598_vm4, %v2779_v47, %v2780_v50  ;;  %v1055_v48 = vsel %vm451_vm2, %v2769_v32, %v2770_v19  ;;  %v1166_v63 = vsel %vm598_vm4, %v2780_v50, %v2794_v25 }
 0x239   :  { %v1173_v29 = vmax.f32 %v1119_v30, %v1167_v41  ;;  %v1061_v53 = vmax.f32 %v997_v10, %v1055_v48 }
 0x23b   :  { %v4130_v44 = vmax.f32 %v1061_v53, %v1173_v29 }
 0x248   :  { %v2788_v12 = vpop.permute.xlu0 %2787  ;;  %v2783_v24 = vpop.permute.xlu1 %2782 }
 0x249   :  { %v2789_v49 = vunpack.i.l.bf16 %v2788_v12  ;;  %v2784_v21 = vunpack.i.l.bf16 %v2783_v24  ;;  %v4138_v10 = vpop.permute.xlu2 %2807  ;;  %v2790_v20 = vunpack.i.h.bf16 %v2788_v12 }
 0x24a   :  { %v2809_v5 = vunpack.i.l.bf16 %v4138_v10 }
 0x24b   :  { %v1118_v11 = vsel %vm549_vm5, %v2775_v23, %v2789_v49  ;;  %v1054_v27 = vsel %vm451_vm2, %v2770_v19, %v2784_v21  ;;  %v1117_v33 = vsel %vm549_vm5, %v2789_v49, %v2790_v20  ;;  %v1165_v19 = vsel %vm598_vm4, %v2794_v25, %v2795_v17 }
 0x24c   :  { %v1174_v58 = vmax.f32 %v1118_v11, %v1166_v63  ;;  %v1062_v3 = vmax.f32 %v998_v0, %v1054_v27  ;;  %v2785_v0 = vunpack.i.h.bf16 %v2783_v24  ;;  %v1175_v29 = vmax.f32 %v1117_v33, %v1165_v19 }
 0x24e   :  { %v4132_v14 = vmax.f32 %v1062_v3, %v1174_v58  ;;  %v1053_v40 = vsel %vm451_vm2, %v2784_v21, %v2785_v0  ;;  %v2810_v58 = vunpack.i.h.bf16 %v4138_v10 }
 0x24f   :  { %v1063_v12 = vmax.f32 %v999_v61, %v1053_v40 }
 0x250   :  { %v2891_v28 = vpack.i.bf16 %v4132_v14, %v4130_v44 }
 0x251   :  { %v2823_v59 = vpop.permute.xlu2 %2822  ;;  %v4166_v3 = vmax.f32 %v1063_v12, %v1175_v29 }
 0x252   :  { %2892 = vrot.lane.b32.xlu1 %v2891_v28, %s3131_s26  ;;  %2887 = vrot.lane.b32.xlu0 %v2891_v28, %s3134_s13  ;;  %v2824_v30 = vunpack.i.l.bf16 %v2823_v59  ;;  %v2825_v11 = vunpack.i.h.bf16 %v2823_v59  ;;  %v1168_v28 = vsel %vm598_vm4, %v2809_v5, %v2779_v47 }
 0x254   :  { %v1164_v6 = vsel %vm598_vm4, %v2795_v17, %v2824_v30  ;;  %v1163_v33 = vsel %vm598_vm4, %v2824_v30, %v2825_v11 }
 0x259   :  { %v4148_v23 = vpop.permute.xlu2 %2832 }
 0x25a   :  { %v2834_v40 = vunpack.i.l.bf16 %v4148_v23  ;;  %v2835_v1 = vunpack.i.h.bf16 %v4148_v23 }
 0x260   :  { %v4140_v43 = vpop.permute.xlu0 %2797 }
 0x261   :  { %v4142_v37 = vpop.permute.xlu1 %2802  ;;  %v2799_v49 = vunpack.i.l.bf16 %v4140_v43  ;;  %v2800_v59 = vunpack.i.h.bf16 %v4140_v43 }
 0x262   :  { %v2804_v25 = vunpack.i.l.bf16 %v4142_v37 }
 0x263   :  { %v1056_v22 = vsel %vm451_vm2, %v2799_v49, %v2769_v32 }
 0x264   :  { %v1120_v47 = vsel %vm549_vm5, %v2804_v25, %v2774_v15  ;;  %v1060_v15 = vmax.f32 %v996_v35, %v1056_v22  ;;  %v1121_v36 = vsel %vm549_vm5, %v2834_v40, %v2804_v25 }
 0x265   :  { %v1172_v30 = vmax.f32 %v1120_v47, %v1168_v28 }
 0x268   :  { %v2813_v50 = vpop.permute.xlu0 %2812 }
 0x269   :  { %v2814_v41 = vunpack.i.l.bf16 %v2813_v50  ;;  %v2818_v48 = vpop.permute.xlu1 %2817  ;;  %v2815_v53 = vunpack.i.h.bf16 %v2813_v50  ;;  %v2853_v50 = vpop.permute.xlu2 %2852 }
 0x26a   :  { %v2819_v24 = vunpack.i.l.bf16 %v2818_v48  ;;  %v2820_v63 = vunpack.i.h.bf16 %v2818_v48  ;;  %v2855_v26 = vunpack.i.h.bf16 %v2853_v50 }
 0x26b   :  { %v1052_v21 = vsel %vm451_vm2, %v2785_v0, %v2814_v41  ;;  %v1051_v10 = vsel %vm451_vm2, %v2814_v41, %v2815_v53  ;;  %v1050_v43 = vsel %vm451_vm2, %v2815_v53, %v2800_v59 }
 0x26c   :  { %v1064_v27 = vmax.f32 %v1000_v39, %v1052_v21  ;;  %v1116_v61 = vsel %vm549_vm5, %v2790_v20, %v2819_v24  ;;  %v2805_v39 = vunpack.i.h.bf16 %v4142_v37  ;;  %v1115_v17 = vsel %vm549_vm5, %v2819_v24, %v2820_v63 }
 0x26d   :  { %v1176_v0 = vmax.f32 %v1116_v61, %v1164_v6  ;;  %v1162_v20 = vsel %vm598_vm4, %v2825_v11, %v2810_v58  ;;  %v1065_v48 = vmax.f32 %v1001_v42, %v1051_v10  ;;  %v1177_v29 = vmax.f32 %v1115_v17, %v1163_v33 }
 0x26e   :  { %v1114_v19 = vsel %vm549_vm5, %v2820_v63, %v2805_v39  ;;  %v1066_v24 = vmax.f32 %v1002_v62, %v1050_v43  ;;  %v1113_v28 = vsel %vm549_vm5, %v2805_v39, %v2835_v1 }
 0x26f   :  { %v4186_v32 = vmax.f32 %v1064_v27, %v1176_v0  ;;  %v1178_v51 = vmax.f32 %v1114_v19, %v1162_v20 }
 0x270   :  { %v4188_v37 = vpop.permute.xlu0 %2827 }
 0x271   :  { %v2829_v8 = vunpack.i.l.bf16 %v4188_v37  ;;  %v4196_v41 = vpop.permute.xlu1 %2837  ;;  %v2906_v21 = vpack.i.bf16 %v4186_v32, %v4166_v3  ;;  %v2830_v35 = vunpack.i.h.bf16 %v4188_v37  ;;  %v4229_v11 = vmax.f32 %v1066_v24, %v1178_v51 }
 0x272   :  { %v2839_v12 = vunpack.i.l.bf16 %v4196_v41  ;;  %v2840_v42 = vunpack.i.h.bf16 %v4196_v41 }
 0x273   :  { %v1057_v53 = vsel %vm451_vm2, %v2829_v8, %v2799_v49  ;;  %2907 = vrot.lane.b32.xlu2 %v2906_v21, %s3134_s13  ;;  %v4224_v49 = vmax.f32 %v1065_v48, %v1177_v29  ;;  %v1049_v27 = vsel %vm451_vm2, %v2800_v59, %v2830_v35  ;;  %v4243_v59 = vpop.permute.xlu2 %2867 }
 0x274   :  { %v1059_v4 = vmax.f32 %v995_v54, %v1057_v53  ;;  %v1169_v62 = vsel %vm598_vm4, %v2839_v12, %v2809_v5  ;;  %v4227_v54 = vmax.f32 %v1060_v15, %v1172_v30  ;;  %v1161_v25 = vsel %vm598_vm4, %v2810_v58, %v2840_v42 }
 0x275   :  { %v1171_v63 = vmax.f32 %v1121_v36, %v1169_v62  ;;  %v2854_v5 = vunpack.i.l.bf16 %v2853_v50  ;;  %v1067_v58 = vmax.f32 %v1003_v57, %v1049_v27  ;;  %v1179_v43 = vmax.f32 %v1113_v28, %v1161_v25 }
 0x276   :  { %v2921_v20 = vpack.i.bf16 %v4227_v54, %v4224_v49  ;;  %v2869_v57 = vunpack.i.l.bf16 %v4243_v59  ;;  %v2870_v34 = vunpack.i.h.bf16 %v4243_v59 }
 0x277   :  { %v4235_v61 = vmax.f32 %v1059_v4, %v1171_v63  ;;  %v1160_v47 = vsel %vm598_vm4, %v2840_v42, %v2854_v5  ;;  %v4259_v30 = vmax.f32 %v1067_v58, %v1179_v43  ;;  %v1159_v50 = vsel %vm598_vm4, %v2854_v5, %v2855_v26 }
 0x278   :  { %v2848_v6 = vpop.permute.xlu0 %2847  ;;  %v1158_v42 = vsel %vm598_vm4, %v2855_v26, %v2869_v57 }
 0x279   :  { %v2849_v0 = vunpack.i.l.bf16 %v2848_v6  ;;  %v2843_v22 = vpop.permute.xlu1 %2842  ;;  %v2901_v17 = vpack.i.bf16 %v4235_v61, %v4229_v11  ;;  %v2850_v33 = vunpack.i.h.bf16 %v2848_v6 }
 0x27a   :  { %v2844_v10 = vunpack.i.l.bf16 %v2843_v22  ;;  %v2845_v15 = vunpack.i.h.bf16 %v2843_v22 }
 0x27b   :  { %v1112_v39 = vsel %vm549_vm5, %v2835_v1, %v2849_v0  ;;  %2902 = vrot.lane.b32.xlu1 %v2901_v17, %s3131_s26  ;;  %2897 = vrot.lane.b32.xlu0 %v2901_v17, %s3134_s13  ;;  %v1111_v53 = vsel %vm549_vm5, %v2849_v0, %v2850_v33  ;;  %v2883_v5 = vpop.permute.xlu2 %2882 }
 0x27c   :  { %v1180_v19 = vmax.f32 %v1112_v39, %v1160_v47  ;;  %v1048_v48 = vsel %vm451_vm2, %v2830_v35, %v2844_v10  ;;  %2922 = vrot.lane.b32.xlu2 %v2921_v20, %s3131_s26  ;;  %v1047_v51 = vsel %vm451_vm2, %v2844_v10, %v2845_v15  ;;  %v1181_v62 = vmax.f32 %v1111_v53, %v1159_v50 }
 0x27d   :  { %v1068_v29 = vmax.f32 %v1004_v2, %v1048_v48  ;;  %v1069_v63 = vmax.f32 %v1005_v7, %v1047_v51  ;;  %v2885_v9 = vunpack.i.h.bf16 %v2883_v5 }
 0x27f   :  { %v4261_v24 = vmax.f32 %v1068_v29, %v1180_v19  ;;  %v4285_v7 = vmax.f32 %v1069_v63, %v1181_v62 }
 0x280   :  { %v2858_v35 = vpop.permute.xlu0 %2857 }
 0x281   :  { %v2859_v18 = vunpack.i.l.bf16 %v2858_v35  ;;  %v2863_v2 = vpop.permute.xlu1 %2862  ;;  %v2926_v4 = vpack.i.bf16 %v4261_v24, %v4259_v30  ;;  %v2860_v27 = vunpack.i.h.bf16 %v2858_v35 }
 0x282   :  { %v2864_v36 = vunpack.i.l.bf16 %v2863_v2  ;;  %v2865_v6 = vunpack.i.h.bf16 %v2863_v2 }
 0x283   :  { %v1046_v1 = vsel %vm451_vm2, %v2845_v15, %v2859_v18  ;;  %2917 = vrot.lane.b32.xlu1 %v2906_v21, %s3131_s26  ;;  %2912 = vrot.lane.b32.xlu0 %v2921_v20, %s3134_s13  ;;  %v1045_v10 = vsel %vm451_vm2, %v2859_v18, %v2860_v27 }
 0x284   :  { %v1070_v25 = vmax.f32 %v1006_v13, %v1046_v1  ;;  %v1110_v28 = vsel %vm549_vm5, %v2850_v33, %v2864_v36  ;;  %2927 = vrot.lane.b32.xlu2 %v2926_v4, %s3134_s13  ;;  %v2884_v13 = vunpack.i.l.bf16 %v2883_v5  ;;  %v1109_v21 = vsel %vm549_vm5, %v2864_v36, %v2865_v6 }
 0x285   :  { %v1182_v0 = vmax.f32 %v1110_v28, %v1158_v42  ;;  %v1157_v33 = vsel %vm598_vm4, %v2869_v57, %v2870_v34  ;;  %v1071_v48 = vmax.f32 %v1007_v31, %v1045_v10 }
 0x286   :  { %v1183_v29 = vmax.f32 %v1109_v21, %v1157_v33  ;;  %v1155_v57 = vsel %vm598_vm4, %v2884_v13, %v2885_v9  ;;  %v1156_v51 = vsel %vm598_vm4, %v2870_v34, %v2884_v13 }
 0x287   :  { %v4287_v22 = vmax.f32 %v1070_v25, %v1182_v0 }
 0x288   :  { %v2873_v17 = vpop.permute.xlu0 %2872 }
 0x289   :  { %v2875_v58 = vunpack.i.h.bf16 %v2873_v17  ;;  %v2874_v47 = vunpack.i.l.bf16 %v2873_v17  ;;  %v2878_v20 = vpop.permute.xlu1 %2877  ;;  %v2931_v43 = vpack.i.bf16 %v4287_v22, %v4285_v7 }
 0x28a   :  { %v2880_v59 = vunpack.i.h.bf16 %v2878_v20  ;;  %v2879_v39 = vunpack.i.l.bf16 %v2878_v20 }
 0x28b   :  { %v1043_v19 = vsel %vm451_vm2, %v2874_v47, %v2875_v58  ;;  %v1044_v15 = vsel %vm451_vm2, %v2860_v27, %v2874_v47  ;;  %2937 = vrot.lane.b32.xlu1 %v2926_v4, %s3131_s26  ;;  %2932 = vrot.lane.b32.xlu0 %v2931_v43, %s3134_s13  ;;  %v1058_v50 = vsel %vm451_vm2, %v2875_v58, %v2829_v8 }
 0x28c   :  { %v1072_v26 = vmax.f32 %v1008_v52, %v1044_v15  ;;  %v1107_v53 = vsel %vm549_vm5, %v2879_v39, %v2880_v59  ;;  %v1108_v35 = vsel %vm549_vm5, %v2865_v6, %v2879_v39  ;;  %2942 = vrot.lane.b32.xlu2 %v2931_v43, %s3131_s26  ;;  %v1073_v45 = vmax.f32 %v1009_v46, %v1043_v19 }
 0x28d   :  { %v1184_v55 = vmax.f32 %v1108_v35, %v1156_v51  ;;  %v1185_v31 = vmax.f32 %v1107_v53, %v1155_v57  ;;  %v4318_v52 = vmax.f32 %v1071_v48, %v1183_v29  ;;  %v1122_v16 = vsel %vm549_vm5, %v2880_v59, %v2834_v40  ;;  %v1301_v40 = vld [vmem:[%s5172_s8 + $0x10] sm:$0xff]  ;;  %v4418_v51 = vld [vmem:[%s5174_s3] sm:$0xff] }
 0x28e   :  { %v1170_v46 = vsel %vm598_vm4, %v2885_v9, %v2839_v12  ;;  %v1074_v37 = vmax.f32 %v1010_v60, %v1058_v50 }
 0x28f   :  { %v4320_v18 = vmax.f32 %v1072_v26, %v1184_v55  ;;  %v4324_v4 = vmax.f32 %v1073_v45, %v1185_v31  ;;  %v1186_v8 = vmax.f32 %v1122_v16, %v1170_v46 }
 0x291   :  { %v2946_v2 = vpack.i.bf16 %v4320_v18, %v4318_v52  ;;  %v4344_v23 = vmax.f32 %v1074_v37, %v1186_v8 }
 0x293   :  { %1275 = vrot.lane.b32.xlu1 %v4324_v4, %s3134_s13  ;;  %2947 = vrot.lane.b32.xlu0 %v2946_v2, %s3134_s13 }
 0x294   :  { %2952 = vrot.lane.b32.xlu2 %v2946_v2, %s3131_s26 }
 0x29b   :  { %1295 = vrot.lane.b32.xlu1 %v4344_v23, %s3134_s13  ;;  %1231 = vrot.lane.b32.xlu0 %v4324_v4, %s3131_s26 }
 0x29c   :  { %1292 = vrot.lane.b32.xlu2 %v4344_v23, %s3131_s26 }
 0x2a3   :  { %1304 = vperm.xlu0 %2564, %v1301_v40  }
 0x2c4   :  { %v2893_v41 = vpop.permute.xlu1 %2892  ;;  %v2888_v38 = vpop.permute.xlu0 %2887 }
 0x2c5   :  { %v2895_v60 = vunpack.i.h.bf16 %v2893_v41  ;;  %v2894_v12 = vunpack.i.l.bf16 %v2893_v41  ;;  %v2890_v42 = vunpack.i.h.bf16 %v2888_v38  ;;  %v2889_v36 = vunpack.i.l.bf16 %v2888_v38 }
 0x2c7   :  { %v1289_v62 = vsel %vm1277_vm7, %v2889_v36, %v2890_v42  ;;  %v4360_v63 = vsel %vm500_vm1, %v2894_v12, %v2895_v60 }
 0x2c8   :  { %1317 = vmatpush.msra.mxu0 %v1289_v62 }
 0x2ca   :  { %1318 = vmatpush.msra.mxu0 %v4360_v63 }
 0x2cc   :  { %1319 = vmatpush.msra.mxu0 %v4130_v44 }
 0x2cd   :  { %v2908_v1 = vpop.permute.xlu2 %2907 }
 0x2ce   :  { %v2910_v27 = vunpack.i.h.bf16 %v2908_v1  ;;  %v2909_v25 = vunpack.i.l.bf16 %v2908_v1 }
 0x2d0   :  { %v1288_v6 = vsel %vm1277_vm7, %v2890_v42, %v2909_v25  ;;  %v4368_v28 = vsel %vm1277_vm7, %v2909_v25, %v2910_v27 }
 0x2d1   :  { %1337 = vmatpush.msra.mxu1 %v1288_v6  ;;  %1357 = vmatpush.msrb.mxu2 %v4368_v28 }
 0x2d6   :  { %v2923_v34 = vpop.permute.xlu2 %2922 }
 0x2d7   :  { %v2925_v17 = vunpack.i.h.bf16 %v2923_v34  ;;  %v2924_v59 = vunpack.i.l.bf16 %v2923_v34 }
 0x2d9   :  { %v1245_v19 = vsel %vm500_vm1, %v2925_v17, %v2894_v12 }
 0x2de   :  { %v2928_v53 = vpop.permute.xlu2 %2927 }
 0x2df   :  { %v2930_v2 = vunpack.i.h.bf16 %v2928_v53  ;;  %v2929_v50 = vunpack.i.l.bf16 %v2928_v53 }
 0x2e6   :  { %v4438_v40 = vpop.permute.xlu2 %2942 }
 0x2e7   :  { %v2944_v38 = vunpack.i.l.bf16 %v4438_v40 }
 0x2ed   :  { %v4371_v5 = vpop.permute.xlu1 %2902  ;;  %v4373_v0 = vpop.permute.xlu0 %2897 }
 0x2ee   :  { %v2905_v48 = vunpack.i.h.bf16 %v4371_v5  ;;  %v2900_v29 = vunpack.i.h.bf16 %v4373_v0  ;;  %v2904_v35 = vunpack.i.l.bf16 %v4371_v5  ;;  %v2899_v45 = vunpack.i.l.bf16 %v4373_v0 }
 0x2f0   :  { %v1246_v57 = vsel %vm500_vm1, %v2905_v48, %v2925_v17 }
 0x2f5   :  { %v2918_v9 = vpop.permute.xlu1 %2917  ;;  %v2913_v13 = vpop.permute.xlu0 %2912 }
 0x2f6   :  { %v2920_v10 = vunpack.i.h.bf16 %v2918_v9  ;;  %v2919_v21 = vunpack.i.l.bf16 %v2918_v9  ;;  %v2915_v58 = vunpack.i.h.bf16 %v2913_v13  ;;  %v2914_v47 = vunpack.i.l.bf16 %v2913_v13 }
 0x2f8   :  { %v1243_v20 = vsel %vm500_vm1, %v2895_v60, %v2919_v21  ;;  %v4379_v43 = vsel %vm500_vm1, %v2919_v21, %v2920_v10  ;;  %v1290_v39 = vsel %vm1277_vm7, %v2915_v58, %v2889_v36  ;;  %v4386_v33 = vsel %vm1277_vm7, %v2910_v27, %v2914_v47 }
 0x2f9   :  { %1338 = vmatpush.msra.mxu1 %v1243_v20  ;;  %1358 = vmatpush.msrb.mxu2 %v4379_v43  ;;  %v4395_v15 = vsel %vm500_vm1, %v2920_v10, %v2924_v59  ;;  %v1291_v26 = vsel %vm1277_vm7, %v2900_v29, %v2915_v58  ;;  %v1285_v31 = vsel %vm1277_vm7, %v2914_v47, %v2899_v45 }
 0x2fa   :  { %1320 = vmatpush.msra.mxu0 %v1290_v39  ;;  %1377 = vmatpush.msrb.mxu3 %v4386_v33 }
 0x2fb   :  { %1339 = vmatpush.msra.mxu1 %v4132_v14  ;;  %1359 = vmatpush.msrb.mxu2 %v4166_v3 }
 0x2fc   :  { %1321 = vmatpush.msra.mxu0 %v1245_v19  ;;  %1378 = vmatpush.msrb.mxu3 %v4395_v15 }
 0x2fd   :  { %1340 = vmatpush.msra.mxu1 %v1289_v62  ;;  %1360 = vmatpush.msrb.mxu2 %v1288_v6  ;;  %v2938_v55 = vpop.permute.xlu1 %2937  ;;  %v4428_v16 = vpop.permute.xlu0 %2932 }
 0x2fe   :  { %1322 = vmatpush.msra.mxu0 %v4227_v54  ;;  %1379 = vmatpush.msrb.mxu3 %v4186_v32  ;;  %v2939_v46 = vunpack.i.l.bf16 %v2938_v55  ;;  %v2934_v37 = vunpack.i.l.bf16 %v4428_v16  ;;  %v2940_v8 = vunpack.i.h.bf16 %v2938_v55  ;;  %v2935_v42 = vunpack.i.h.bf16 %v4428_v16 }
 0x2ff   :  { %1341 = vmatpush.msra.mxu1 %v4360_v63  ;;  %1361 = vmatpush.msrb.mxu2 %v1243_v20 }
 0x300   :  { %1323 = vmatpush.msra.mxu0 %v1291_v26  ;;  %1380 = vmatpush.msrb.mxu3 %v4368_v28  ;;  %v1239_v41 = vsel %vm500_vm1, %v2904_v35, %v2939_v46  ;;  %v4459_v60 = vsel %vm500_vm1, %v2939_v46, %v2940_v8  ;;  %v4463_v12 = vsel %vm1277_vm7, %v2930_v2, %v2934_v37 }
 0x301   :  { %1342 = vmatpush.msra.mxu1 %v4130_v44  ;;  %1362 = vmatpush.msrb.mxu2 %v4132_v14  ;;  %v1281_v1 = vsel %vm1277_vm7, %v2934_v37, %v2935_v42 }
 0x302   :  { %1324 = vmatpush.msra.mxu0 %v1246_v57  ;;  %1381 = vmatpush.msrb.mxu3 %v4379_v43 }
 0x303   :  { %1343 = vmatpush.msra.mxu1 %v1290_v39  ;;  %1363 = vmatpush.msrb.mxu2 %v1289_v62  ;;  %v2945_v62 = vunpack.i.h.bf16 %v4438_v40 }
 0x304   :  { %1325 = vmatpush.msra.mxu0 %v4235_v61  ;;  %1382 = vmatpush.msrb.mxu3 %v4166_v3  ;;  %v1240_v61 = vsel %vm500_vm1, %v2924_v59, %v2904_v35 }
 0x305   :  { %2516 = vmatmul.msk.f32.vlgmr.msra.gmra.mxu0 %vm671_vm6, %v4418_v51  ;;  %1344 = vmatpush.msra.mxu1 %v1245_v19  ;;  %v2948_v36 = vpop.permute.xlu0 %2947  ;;  %v1276_v9 = vpop.permute.xlu1 %1275 }
 0x306   :  { %1397 = vmatpush.msrb.mxu0 %v1285_v31  ;;  %1364 = vmatpush.msrb.mxu2 %v4360_v63  ;;  %v2953_v63 = vpop.permute.xlu2 %2952  ;;  %v2950_v27 = vunpack.i.h.bf16 %v2948_v36  ;;  %v2949_v25 = vunpack.i.l.bf16 %v2948_v36 }
 0x307   :  { %1383 = vmatpush.msrb.mxu3 %v1288_v6  ;;  %1345 = vmatpush.msra.mxu1 %v4227_v54  ;;  %v1284_v54 = vsel %vm1277_vm7, %v2899_v45, %v2929_v50  ;;  %v2954_v6 = vunpack.i.l.bf16 %v2953_v63 }
 0x308   :  { %1398 = vmatpush.msrb.mxu0 %v1240_v61  ;;  %1365 = vmatpush.msrb.mxu2 %v4130_v44  ;;  %v4447_v44 = vsel %vm1277_vm7, %v2929_v50, %v2930_v2  ;;  %v1280_v34 = vsel %vm1277_vm7, %v2935_v42, %v2949_v25  ;;  %v1278_v10 = vsel %vm1277_vm7, %v2950_v27, %v1276_v9 }
 0x309   :  { %1384 = vmatpush.msrb.mxu3 %v1243_v20  ;;  %2517 = vmatmul.msk.f32.vlgmr.msra.gmra.mxu1 %vm671_vm6, %v4418_v51  ;;  %v1235_v13 = vsel %vm500_vm1, %v2945_v62, %v2954_v6 }
 0x30a   :  { %2518 = vmatmul.msk.f32.vlgmr.msrb.gmra.mxu2 %vm671_vm6, %v4418_v51  ;;  %1399 = vmatpush.msrb.mxu0 %v4224_v49 }
 0x30b   :  { %1417 = vmatpush.msrb.mxu1 %v1284_v54  ;;  %1437 = vmatpush.msra.mxu2 %v4447_v44 }
 0x30c   :  { %1385 = vmatpush.msrb.mxu3 %v4132_v14  ;;  %1400 = vmatpush.msrb.mxu0 %v4386_v33  ;;  %v4471_v14 = vsel %vm500_vm1, %v2940_v8, %v2944_v38 }
 0x30d   :  { %2519 = vmatmul.msk.f32.vlgmr.msrb.gmra.mxu3 %vm671_vm6, %v4418_v51  ;;  %1418 = vmatpush.msrb.mxu1 %v1239_v41  ;;  %v1296_v17 = vpop.permute.xlu1 %1295 }
 0x30e   :  { %1438 = vmatpush.msra.mxu2 %v4459_v60  ;;  %1457 = vmatpush.msra.mxu3 %v4463_v12  ;;  %v1297_v58 = vsel %vm1277_vm7, %v1276_v9, %v1296_v17  ;;  %v1293_v47 = vpop.permute.xlu2 %1292  ;;  %v1299_v20 = vsel %vm1277_vm7, %v1296_v17, %v2900_v29 }
 0x30f   :  { %1401 = vmatpush.msrb.mxu0 %v4395_v15  ;;  %1419 = vmatpush.msrb.mxu1 %v4229_v11 }
 0x310   :  { %1439 = vmatpush.msra.mxu2 %v4259_v30  ;;  %1458 = vmatpush.msra.mxu3 %v4471_v14 }
 0x311   :  { %1402 = vmatpush.msrb.mxu0 %v4186_v32  ;;  %1420 = vmatpush.msrb.mxu1 %v1285_v31 }
 0x312   :  { %1440 = vmatpush.msra.mxu2 %v1284_v54  ;;  %1459 = vmatpush.msra.mxu3 %v4261_v24 }
 0x313   :  { %1403 = vmatpush.msrb.mxu0 %v4368_v28  ;;  %1421 = vmatpush.msrb.mxu1 %v1240_v61  ;;  %v2955_v28 = vunpack.i.h.bf16 %v2953_v63 }
 0x314   :  { %1441 = vmatpush.msra.mxu2 %v1239_v41  ;;  %1460 = vmatpush.msra.mxu3 %v4447_v44 }
 0x315   :  { %1404 = vmatpush.msrb.mxu0 %v4379_v43  ;;  %1422 = vmatpush.msrb.mxu1 %v4224_v49  ;;  %v1234_v21 = vsel %vm500_vm1, %v2954_v6, %v2955_v28 }
 0x316   :  { %1442 = vmatpush.msra.mxu2 %v4229_v11  ;;  %1461 = vmatpush.msra.mxu3 %v4459_v60 }
 0x317   :  { %1405 = vmatpush.msrb.mxu0 %v4166_v3  ;;  %1423 = vmatpush.msrb.mxu1 %v4386_v33  ;;  %v1236_v3 = vsel %vm500_vm1, %v2944_v38, %v2945_v62 }
 0x318   :  { %1443 = vmatpush.msra.mxu2 %v1285_v31  ;;  %1462 = vmatpush.msra.mxu3 %v4259_v30 }
 0x319   :  { %2520 = vmatmul.msk.f32.vlgmr.msrb.gmra.mxu0 %vm671_vm6, %v4418_v51  ;;  %1424 = vmatpush.msrb.mxu1 %v4395_v15 }
 0x31a   :  { %1477 = vmatpush.msra.mxu0 %v1281_v1  ;;  %1444 = vmatpush.msra.mxu2 %v1240_v61 }
 0x31b   :  { %1463 = vmatpush.msra.mxu3 %v1284_v54  ;;  %1425 = vmatpush.msrb.mxu1 %v4186_v32  ;;  %v1279_v32 = vsel %vm1277_vm7, %v2949_v25, %v2950_v27 }
 0x31c   :  { %1478 = vmatpush.msra.mxu0 %v1236_v3  ;;  %1445 = vmatpush.msra.mxu2 %v4224_v49  ;;  %v1232_v49 = vpop.permute.xlu0 %1231 }
 0x31d   :  { %1464 = vmatpush.msra.mxu3 %v1239_v41  ;;  %2521 = vmatmul.msk.f32.vlgmr.msrb.gmra.mxu1 %vm671_vm6, %v4418_v51 }
 0x31e   :  { %2522 = vmatmul.msk.f32.vlgmr.msra.gmra.mxu2 %vm671_vm6, %v4418_v51  ;;  %1479 = vmatpush.msra.mxu0 %v4285_v7 }
 0x31f   :  { %1497 = vmatpush.msra.mxu1 %v1280_v34  ;;  %1517 = vmatpush.msrb.mxu2 %v1279_v32 }
 0x320   :  { %1465 = vmatpush.msra.mxu3 %v4229_v11  ;;  %1480 = vmatpush.msra.mxu0 %v4463_v12  ;;  %v1233_v11 = vsel %vm500_vm1, %v2955_v28, %v1232_v49 }
 0x321   :  { %2523 = vmatmul.msk.f32.vlgmr.msra.gmra.mxu3 %vm671_vm6, %v4418_v51  ;;  %1498 = vmatpush.msra.mxu1 %v1235_v13 }
 0x322   :  { %1518 = vmatpush.msrb.mxu2 %v1234_v21  ;;  %1537 = vmatpush.msrb.mxu3 %v1278_v10 }
 0x323   :  { %1481 = vmatpush.msra.mxu0 %v4471_v14  ;;  %1499 = vmatpush.msra.mxu1 %v4287_v22 }
 0x324   :  { %1519 = vmatpush.msrb.mxu2 %v4318_v52  ;;  %1538 = vmatpush.msrb.mxu3 %v1233_v11 }
 0x325   :  { %1482 = vmatpush.msra.mxu0 %v4261_v24  ;;  %1500 = vmatpush.msra.mxu1 %v1281_v1 }
 0x326   :  { %1520 = vmatpush.msrb.mxu2 %v1280_v34  ;;  %1539 = vmatpush.msrb.mxu3 %v4320_v18 }
 0x327   :  { %1483 = vmatpush.msra.mxu0 %v4447_v44  ;;  %1501 = vmatpush.msra.mxu1 %v1236_v3 }
 0x328   :  { %1521 = vmatpush.msrb.mxu2 %v1235_v13  ;;  %1540 = vmatpush.msrb.mxu3 %v1279_v32 }
 0x329   :  { %1484 = vmatpush.msra.mxu0 %v4459_v60  ;;  %1502 = vmatpush.msra.mxu1 %v4285_v7 }
 0x32a   :  { %1522 = vmatpush.msrb.mxu2 %v4287_v22  ;;  %1541 = vmatpush.msrb.mxu3 %v1234_v21 }
 0x32b   :  { %1485 = vmatpush.msra.mxu0 %v4259_v30  ;;  %1503 = vmatpush.msra.mxu1 %v4463_v12  ;;  %v1294_v30 = vsel %vm500_vm1, %v1232_v49, %v1293_v47 }
 0x32c   :  { %1523 = vmatpush.msrb.mxu2 %v1281_v1  ;;  %1542 = vmatpush.msrb.mxu3 %v4318_v52 }
 0x32d   :  { %2524 = vmatmul.msk.f32.vlgmr.msra.gmra.mxu0 %vm671_vm6, %v4418_v51  ;;  %1504 = vmatpush.msra.mxu1 %v4471_v14 }
 0x32e   :  { %1557 = vmatpush.msrb.mxu0 %v1297_v58  ;;  %1524 = vmatpush.msrb.mxu2 %v1236_v3 }
 0x32f   :  { %1543 = vmatpush.msrb.mxu3 %v1280_v34  ;;  %1505 = vmatpush.msra.mxu1 %v4261_v24  ;;  %v1298_v24 = vsel %vm500_vm1, %v1293_v47, %v2905_v48  ;;  %v1687_v34 = vld [vmem:[%s5172_s8 + $0x18] sm:$0xff] }
 0x330   :  { %1558 = vmatpush.msrb.mxu0 %v1294_v30  ;;  %1525 = vmatpush.msrb.mxu2 %v4285_v7 }
 0x331   :  { %1544 = vmatpush.msrb.mxu3 %v1235_v13  ;;  %2525 = vmatmul.msk.f32.vlgmr.msra.gmra.mxu1 %vm671_vm6, %v4418_v51 }
 0x332   :  { %2526 = vmatmul.msk.f32.vlgmr.msrb.gmra.mxu2 %vm671_vm6, %v4418_v51  ;;  %1559 = vmatpush.msrb.mxu0 %v4324_v4 }
 0x333   :  { %1577 = vmatpush.msrb.mxu1 %v1299_v20  ;;  %1545 = vmatpush.msrb.mxu3 %v4287_v22  ;;  %v1305_v22 = vpop.permute.xlu0 %1304 }
 0x334   :  { %2527 = vmatmul.msk.f32.vlgmr.msrb.gmra.mxu3 %vm671_vm6, %v4418_v51  ;;  %1560 = vmatpush.msrb.mxu0 %v1278_v10 }
 0x335   :  { %1578 = vmatpush.msrb.mxu1 %v1298_v24 }
 0x336   :  { %1561 = vmatpush.msrb.mxu0 %v1233_v11 }
 0x337   :  { %1579 = vmatpush.msrb.mxu1 %v4344_v23 }
 0x338   :  { %1562 = vmatpush.msrb.mxu0 %v4320_v18 }
 0x339   :  { %1580 = vmatpush.msrb.mxu1 %v1297_v58 }
 0x33a   :  { %1563 = vmatpush.msrb.mxu0 %v1279_v32 }
 0x33b   :  { %1581 = vmatpush.msrb.mxu1 %v1294_v30 }
 0x33c   :  { %1564 = vmatpush.msrb.mxu0 %v1234_v21 }
 0x33d   :  { %1582 = vmatpush.msrb.mxu1 %v4324_v4 }
 0x33e   :  { %1565 = vmatpush.msrb.mxu0 %v4318_v52 }
 0x33f   :  { %1583 = vmatpush.msrb.mxu1 %v1278_v10  ;;  %2528 = vmatmul.msk.f32.vlgmr.msrb.gmra.mxu0 %vm671_vm6, %v4418_v51 }
 0x341   :  { %1584 = vmatpush.msrb.mxu1 %v1233_v11 }
 0x343   :  { %1585 = vmatpush.msrb.mxu1 %v4320_v18 }
 0x344   :  { %2529 = vmatmul.msk.f32.vlgmr.msrb.gmra.mxu1 %vm671_vm6, %v4418_v51 }
 0x382   :  { %v1327_v23 = vpop.f32.mrf.mxu0 }
 0x383   :  { %v4582_v45 = vadd.f32 %v1327_v23, %v1305_v22 }
 0x385   :  { %v1590_v16 = vmax.f32 %v4582_v45, 0.0 }
 0x386   :  { %v1347_v59 = vpop.f32.mrf.mxu1 }
 0x387   :  { %v1348_v39 = vadd.f32 %v1347_v59, %v1305_v22 }
 0x389   :  { %v4571_v15 = vmax.f32 %v1348_v39, 0.0 }
 0x38d   :  { %v1367_v7 = vpop.f32.mrf.mxu2 }
 0x38e   :  { %v1368_v5 = vadd.f32 %v1367_v7, %v1305_v22 }
 0x390   :  { %v1387_v0 = vpop.f32.mrf.mxu3  ;;  %v4564_v4 = vmax.f32 %v1368_v5, 0.0 }
 0x391   :  { %v1388_v43 = vadd.f32 %v1387_v0, %v1305_v22 }
 0x393   :  { %v4566_v52 = vmax.f32 %v1388_v43, 0.0 }
 0x395   :  { %v2971_v33 = vpack.i.bf16 %v4566_v52, %v4564_v4 }
 0x396   :  { %v1407_v19 = vpop.f32.mrf.mxu0 }
 0x397   :  { %v1408_v18 = vadd.f32 %v1407_v19, %v1305_v22  ;;  %2972 = vrot.lane.b32.xlu0 %v2971_v33, %s3131_s26 }
 0x399   :  { %v4573_v48 = vmax.f32 %v1408_v18, 0.0 }
 0x39a   :  { %v1427_v37 = vpop.f32.mrf.mxu1 }
 0x39b   :  { %v2961_v29 = vpack.i.bf16 %v4571_v15, %v4573_v48  ;;  %v1428_v8 = vadd.f32 %v1427_v37, %v1305_v22 }
 0x39d   :  { %2962 = vrot.lane.b32.xlu1 %v2961_v29, %s3131_s26  ;;  %2957 = vrot.lane.b32.xlu2 %v2961_v29, %s3134_s13  ;;  %v4597_v44 = vmax.f32 %v1428_v8, 0.0 }
 0x3a1   :  { %v1447_v26 = vpop.f32.mrf.mxu2 }
 0x3a2   :  { %v1448_v57 = vadd.f32 %v1447_v26, %v1305_v22 }
 0x3a4   :  { %v1467_v53 = vpop.f32.mrf.mxu3  ;;  %v4584_v55 = vmax.f32 %v1448_v57, 0.0 }
 0x3a5   :  { %v1468_v51 = vadd.f32 %v1467_v53, %v1305_v22  ;;  %2967 = vrot.lane.b32.xlu1 %v2971_v33, %s3134_s13 }
 0x3a7   :  { %v4580_v35 = vmax.f32 %v1468_v51, 0.0 }
 0x3a9   :  { %v2991_v50 = vpack.i.bf16 %v4580_v35, %v4584_v55 }
 0x3aa   :  { %v1487_v31 = vpop.f32.mrf.mxu0 }
 0x3ab   :  { %v1488_v2 = vadd.f32 %v1487_v31, %v1305_v22  ;;  %v4683_v31 = vld [vmem:[%s5175_s4] sm:$0xff] }
 0x3ad   :  { %v4589_v61 = vmax.f32 %v1488_v2, 0.0  ;;  %2992 = vrot.lane.b32.xlu1 %v2991_v50, %s3131_s26 }
 0x3ae   :  { %v1507_v12 = vpop.f32.mrf.mxu1 }
 0x3af   :  { %v2981_v46 = vpack.i.bf16 %v1590_v16, %v4589_v61  ;;  %v1508_v62 = vadd.f32 %v1507_v12, %v1305_v22 }
 0x3b1   :  { %2982 = vrot.lane.b32.xlu2 %v2981_v46, %s3131_s26  ;;  %2977 = vrot.lane.b32.xlu0 %v2981_v46, %s3134_s13  ;;  %v4614_v25 = vmax.f32 %v1508_v62, 0.0 }
 0x3b5   :  { %v1527_v40 = vpop.f32.mrf.mxu2 }
 0x3b6   :  { %v1528_v54 = vadd.f32 %v1527_v40, %v1305_v22 }
 0x3b7   :  { %v1547_v38 = vpop.f32.mrf.mxu3 }
 0x3b8   :  { %v4599_v41 = vmax.f32 %v1528_v54, 0.0  ;;  %v1548_v14 = vadd.f32 %v1547_v38, %v1305_v22 }
 0x3b9   :  { %2987 = vrot.lane.b32.xlu2 %v2991_v50, %s3134_s13 }
 0x3ba   :  { %v2996_v60 = vpack.i.bf16 %v4599_v41, %v4597_v44  ;;  %v4608_v63 = vmax.f32 %v1548_v14, 0.0 }
 0x3bc   :  { %v1567_v42 = vpop.f32.mrf.mxu0  ;;  %2997 = vrot.lane.b32.xlu0 %v2996_v60, %s3134_s13  ;;  %3002 = vrot.lane.b32.xlu1 %v2996_v60, %s3131_s26 }
 0x3bd   :  { %v4606_v36 = vadd.f32 %v1567_v42, %v1305_v22 }
 0x3bf   :  { %v1602_v1 = vmax.f32 %v4606_v36, 0.0 }
 0x3c1   :  { %v3006_v27 = vpack.i.bf16 %v1602_v1, %v4608_v63  ;;  %v1587_v3 = vpop.f32.mrf.mxu1 }
 0x3c2   :  { %v1588_v6 = vadd.f32 %v1587_v3, %v1305_v22 }
 0x3c3   :  { %3007 = vrot.lane.b32.xlu2 %v3006_v27, %s3134_s13 }
 0x3c4   :  { %3012 = vrot.lane.b32.xlu0 %v3006_v27, %s3131_s26  ;;  %1657 = vrot.lane.b32.xlu1 %v4614_v25, %s3134_s13  ;;  %v1603_v28 = vmax.f32 %v1588_v6, 0.0 }
 0x3cb   :  { %1622 = vrot.lane.b32.xlu2 %v4614_v25, %s3131_s26 }
 0x3cc   :  { %1683 = vrot.lane.b32.xlu0 %v1603_v28, %s3134_s13  ;;  %1680 = vrot.lane.b32.xlu1 %v1603_v28, %s3131_s26 }
 0x3d3   :  { %1690 = vperm.xlu2 %2765, %v1687_v34  }
 0x3f7   :  { %v4629_v9 = vpop.permute.xlu2 %2957 }
 0x3f8   :  { %v2959_v13 = vunpack.i.l.bf16 %v4629_v9  ;;  %v2960_v23 = vunpack.i.h.bf16 %v4629_v9 }
 0x409   :  { %v2973_v49 = vpop.permute.xlu0 %2972 }
 0x40a   :  { %v2975_v10 = vunpack.i.h.bf16 %v2973_v49  ;;  %v2974_v11 = vunpack.i.l.bf16 %v2973_v49 }
 0x40b   :  { %v4643_v24 = vpop.permute.xlu2 %2982 }
 0x40c   :  { %v4649_v7 = vsel %vm500_vm1, %v2974_v11, %v2975_v10  ;;  %v2985_v19 = vunpack.i.h.bf16 %v4643_v24  ;;  %v2984_v46 = vunpack.i.l.bf16 %v4643_v24 }
 0x40f   :  { %v4627_v32 = vpop.permute.xlu1 %2962 }
 0x410   :  { %v2964_v17 = vunpack.i.l.bf16 %v4627_v32  ;;  %v2965_v5 = vunpack.i.h.bf16 %v4627_v32 }
 0x412   :  { %v4655_v22 = vsel %vm500_vm1, %v2975_v10, %v2964_v17  ;;  %v1637_v43 = vsel %vm500_vm1, %v2965_v5, %v2974_v11  ;;  %v1638_v51 = vsel %vm500_vm1, %v2985_v19, %v2965_v5 }
 0x413   :  { %v2988_v33 = vpop.permute.xlu2 %2987 }
 0x414   :  { %v2990_v26 = vunpack.i.h.bf16 %v2988_v33  ;;  %v2989_v53 = vunpack.i.l.bf16 %v2988_v33 }
 0x416   :  { %v4695_v37 = vsel %vm1277_vm7, %v2989_v53, %v2990_v26 }
 0x417   :  { %v2968_v21 = vpop.permute.xlu1 %2967 }
 0x418   :  { %v2970_v58 = vunpack.i.h.bf16 %v2968_v21  ;;  %v2969_v47 = vunpack.i.l.bf16 %v2968_v21 }
 0x41a   :  { %v4635_v30 = vsel %vm1277_vm7, %v2969_v47, %v2970_v58  ;;  %v4641_v20 = vsel %vm1277_vm7, %v2970_v58, %v2959_v13  ;;  %v1672_v0 = vsel %vm1277_vm7, %v2960_v23, %v2969_v47 }
 0x41b   :  { %1703 = vmatpush.msra.mxu2 %v4635_v30  ;;  %1723 = vmatpush.msra.mxu3 %v4641_v20 }
 0x41d   :  { %1704 = vmatpush.msra.mxu2 %v4649_v7  ;;  %1724 = vmatpush.msra.mxu3 %v4655_v22  ;;  %v4742_v62 = vpop.permute.xlu2 %3007 }
 0x41e   :  { %v3010_v3 = vunpack.i.h.bf16 %v4742_v62  ;;  %v3009_v6 = vunpack.i.l.bf16 %v4742_v62 }
 0x41f   :  { %1705 = vmatpush.msra.mxu2 %v4564_v4  ;;  %1725 = vmatpush.msra.mxu3 %v4566_v52  ;;  %v2993_v18 = vpop.permute.xlu1 %2992 }
 0x420   :  { %v2995_v2 = vunpack.i.h.bf16 %v2993_v18  ;;  %v2994_v50 = vunpack.i.l.bf16 %v2993_v18 }
 0x421   :  { %1706 = vmatpush.msra.mxu2 %v1672_v0  ;;  %1726 = vmatpush.msra.mxu3 %v4635_v30 }
 0x422   :  { %v4711_v8 = vsel %vm500_vm1, %v2994_v50, %v2995_v2  ;;  %v4717_v40 = vsel %vm500_vm1, %v2995_v2, %v2984_v46 }
 0x423   :  { %v4668_v59 = vpop.permute.xlu0 %2977  ;;  %1707 = vmatpush.msra.mxu2 %v1637_v43  ;;  %1727 = vmatpush.msra.mxu3 %v4649_v7 }
 0x424   :  { %v2980_v39 = vunpack.i.h.bf16 %v4668_v59  ;;  %v2979_v57 = vunpack.i.l.bf16 %v4668_v59 }
 0x425   :  { %1708 = vmatpush.msra.mxu2 %v4571_v15  ;;  %1728 = vmatpush.msra.mxu3 %v4564_v4  ;;  %v1623_v49 = vpop.permute.xlu2 %1622 }
 0x426   :  { %v1673_v29 = vsel %vm1277_vm7, %v2980_v39, %v2960_v23  ;;  %v4701_v45 = vsel %vm1277_vm7, %v2990_v26, %v2979_v57 }
 0x427   :  { %1709 = vmatpush.msra.mxu2 %v1673_v29  ;;  %1729 = vmatpush.msra.mxu3 %v1672_v0 }
 0x429   :  { %1710 = vmatpush.msra.mxu2 %v1638_v51  ;;  %1730 = vmatpush.msra.mxu3 %v1637_v43 }
 0x42b   :  { %1711 = vmatpush.msra.mxu2 %v1590_v16  ;;  %1731 = vmatpush.msra.mxu3 %v4571_v15 }
 0x42c   :  { %2530 = vmatmul.msk.f32.vlgmr.msra.gmra.mxu2 %vm671_vm6, %v4683_v31  ;;  %2531 = vmatmul.msk.f32.vlgmr.msra.gmra.mxu3 %vm671_vm6, %v4683_v31 }
 0x42d   :  { %1783 = vmatpush.msrb.mxu2 %v4695_v37  ;;  %1803 = vmatpush.msrb.mxu3 %v4701_v45 }
 0x42e   :  { %v4705_v15 = vpop.permute.xlu0 %2997  ;;  %v4707_v16 = vpop.permute.xlu1 %3002 }
 0x42f   :  { %v2999_v54 = vunpack.i.l.bf16 %v4705_v15  ;;  %v3004_v38 = vunpack.i.l.bf16 %v4707_v16  ;;  %1784 = vmatpush.msrb.mxu2 %v4711_v8  ;;  %1804 = vmatpush.msrb.mxu3 %v4717_v40  ;;  %v3000_v27 = vunpack.i.h.bf16 %v4705_v15 }
 0x431   :  { %v1669_v60 = vsel %vm1277_vm7, %v2959_v13, %v2999_v54  ;;  %v1668_v12 = vsel %vm1277_vm7, %v2999_v54, %v2989_v53  ;;  %1785 = vmatpush.msrb.mxu2 %v4584_v55  ;;  %v1634_v14 = vsel %vm500_vm1, %v2964_v17, %v3004_v38  ;;  %v1633_v42 = vsel %vm500_vm1, %v3004_v38, %v2994_v50 }
 0x432   :  { %1743 = vmatpush.msra.mxu0 %v1669_v60  ;;  %1763 = vmatpush.msra.mxu1 %v1668_v12  ;;  %v4765_v9 = vsel %vm1277_vm7, %v3000_v27, %v3009_v6  ;;  %v3005_v13 = vunpack.i.h.bf16 %v4707_v16 }
 0x433   :  { %1805 = vmatpush.msrb.mxu3 %v4580_v35  ;;  %1786 = vmatpush.msrb.mxu2 %v1668_v12 }
 0x434   :  { %1744 = vmatpush.msra.mxu0 %v1634_v14  ;;  %1764 = vmatpush.msra.mxu1 %v1633_v42  ;;  %v1629_v17 = vsel %vm500_vm1, %v1623_v49, %v3005_v13 }
 0x435   :  { %1806 = vmatpush.msrb.mxu3 %v4695_v37  ;;  %1787 = vmatpush.msrb.mxu2 %v1633_v42 }
 0x436   :  { %1745 = vmatpush.msra.mxu0 %v4573_v48  ;;  %1765 = vmatpush.msra.mxu1 %v4597_v44  ;;  %v4752_v28 = vpop.permute.xlu0 %3012  ;;  %v1658_v32 = vpop.permute.xlu1 %1657 }
 0x437   :  { %1807 = vmatpush.msrb.mxu3 %v4711_v8  ;;  %1788 = vmatpush.msrb.mxu2 %v4597_v44  ;;  %v3014_v34 = vunpack.i.l.bf16 %v4752_v28  ;;  %v1665_v10 = vsel %vm1277_vm7, %v2979_v57, %v1658_v32  ;;  %v1664_v21 = vsel %vm1277_vm7, %v1658_v32, %v3000_v27 }
 0x438   :  { %1746 = vmatpush.msra.mxu0 %v4641_v20  ;;  %1766 = vmatpush.msra.mxu1 %v1669_v60 }
 0x439   :  { %1808 = vmatpush.msrb.mxu3 %v4584_v55  ;;  %1789 = vmatpush.msrb.mxu2 %v1669_v60 }
 0x43a   :  { %1747 = vmatpush.msra.mxu0 %v4655_v22  ;;  %1767 = vmatpush.msra.mxu1 %v1634_v14 }
 0x43b   :  { %1809 = vmatpush.msrb.mxu3 %v1668_v12  ;;  %1790 = vmatpush.msrb.mxu2 %v1634_v14  ;;  %v1992_v14 = vld [vmem:[%s5172_s8 + $0x20] sm:$0xff] }
 0x43c   :  { %1748 = vmatpush.msra.mxu0 %v4566_v52  ;;  %1768 = vmatpush.msra.mxu1 %v4573_v48 }
 0x43d   :  { %1810 = vmatpush.msrb.mxu3 %v1633_v42  ;;  %1791 = vmatpush.msrb.mxu2 %v4573_v48  ;;  %v3015_v48 = vunpack.i.h.bf16 %v4752_v28 }
 0x43e   :  { %1749 = vmatpush.msra.mxu0 %v4635_v30  ;;  %1769 = vmatpush.msra.mxu1 %v4641_v20  ;;  %v1684_v58 = vpop.permute.xlu0 %1683  ;;  %v1681_v47 = vpop.permute.xlu1 %1680 }
 0x43f   :  { %1811 = vmatpush.msrb.mxu3 %v4597_v44  ;;  %2534 = vmatmul.msk.f32.vlgmr.msrb.gmra.mxu2 %vm671_vm6, %v4683_v31  ;;  %v1679_v44 = vsel %vm1277_vm7, %v3009_v6, %v3010_v3  ;;  %v1676_v11 = vsel %vm500_vm1, %v3014_v34, %v3015_v48  ;;  %v1685_v30 = vsel %vm1277_vm7, %v3010_v3, %v1684_v58  ;;  %v1691_v20 = vpop.permute.xlu2 %1690 }
 0x440   :  { %1750 = vmatpush.msra.mxu0 %v4649_v7  ;;  %1770 = vmatpush.msra.mxu1 %v4655_v22 }
 0x441   :  { %2535 = vmatmul.msk.f32.vlgmr.msrb.gmra.mxu3 %vm671_vm6, %v4683_v31  ;;  %1863 = vmatpush.msra.mxu2 %v4765_v9 }
 0x442   :  { %1883 = vmatpush.msra.mxu3 %v1679_v44  ;;  %1751 = vmatpush.msra.mxu0 %v4564_v4  ;;  %v1628_v4 = vsel %vm500_vm1, %v3005_v13, %v3014_v34 }
 0x443   :  { %1771 = vmatpush.msra.mxu1 %v4566_v52  ;;  %2532 = vmatmul.msk.f32.vlgmr.msra.gmra.mxu0 %vm671_vm6, %v4683_v31  ;;  %v1630_v52 = vsel %vm500_vm1, %v2984_v46, %v1623_v49 }
 0x444   :  { %2533 = vmatmul.msk.f32.vlgmr.msra.gmra.mxu1 %vm671_vm6, %v4683_v31  ;;  %1823 = vmatpush.msrb.mxu0 %v1665_v10 }
 0x445   :  { %1843 = vmatpush.msrb.mxu1 %v1664_v21  ;;  %1864 = vmatpush.msra.mxu2 %v1628_v4 }
 0x446   :  { %1884 = vmatpush.msra.mxu3 %v1676_v11  ;;  %1824 = vmatpush.msrb.mxu0 %v1630_v52 }
 0x447   :  { %1844 = vmatpush.msrb.mxu1 %v1629_v17  ;;  %1865 = vmatpush.msra.mxu2 %v4599_v41 }
 0x448   :  { %1885 = vmatpush.msra.mxu3 %v4608_v63  ;;  %1825 = vmatpush.msrb.mxu0 %v4589_v61 }
 0x449   :  { %1845 = vmatpush.msrb.mxu1 %v4614_v25  ;;  %1866 = vmatpush.msra.mxu2 %v1664_v21 }
 0x44a   :  { %1886 = vmatpush.msra.mxu3 %v4765_v9  ;;  %1826 = vmatpush.msrb.mxu0 %v4701_v45 }
 0x44b   :  { %1846 = vmatpush.msrb.mxu1 %v1665_v10  ;;  %1867 = vmatpush.msra.mxu2 %v1629_v17 }
 0x44c   :  { %1887 = vmatpush.msra.mxu3 %v1628_v4  ;;  %1827 = vmatpush.msrb.mxu0 %v4717_v40 }
 0x44d   :  { %1847 = vmatpush.msrb.mxu1 %v1630_v52  ;;  %1868 = vmatpush.msra.mxu2 %v4614_v25 }
 0x44e   :  { %1888 = vmatpush.msra.mxu3 %v4599_v41  ;;  %1828 = vmatpush.msrb.mxu0 %v4580_v35 }
 0x44f   :  { %1848 = vmatpush.msrb.mxu1 %v4589_v61  ;;  %1869 = vmatpush.msra.mxu2 %v1665_v10 }
 0x450   :  { %1889 = vmatpush.msra.mxu3 %v1664_v21  ;;  %1829 = vmatpush.msrb.mxu0 %v4695_v37 }
 0x451   :  { %1849 = vmatpush.msrb.mxu1 %v4701_v45  ;;  %1870 = vmatpush.msra.mxu2 %v1630_v52 }
 0x452   :  { %1890 = vmatpush.msra.mxu3 %v1629_v17  ;;  %1830 = vmatpush.msrb.mxu0 %v4711_v8 }
 0x453   :  { %1850 = vmatpush.msrb.mxu1 %v4717_v40  ;;  %1871 = vmatpush.msra.mxu2 %v4589_v61  ;;  %v1682_v61 = vsel %vm500_vm1, %v3015_v48, %v1681_v47 }
 0x454   :  { %1891 = vmatpush.msra.mxu3 %v4614_v25  ;;  %2538 = vmatmul.msk.f32.vlgmr.msra.gmra.mxu2 %vm671_vm6, %v4683_v31 }
 0x455   :  { %2539 = vmatmul.msk.f32.vlgmr.msra.gmra.mxu3 %vm671_vm6, %v4683_v31  ;;  %1831 = vmatpush.msrb.mxu0 %v4584_v55 }
 0x456   :  { %1851 = vmatpush.msrb.mxu1 %v4580_v35  ;;  %2536 = vmatmul.msk.f32.vlgmr.msrb.gmra.mxu0 %vm671_vm6, %v4683_v31 }
 0x457   :  { %2537 = vmatmul.msk.f32.vlgmr.msrb.gmra.mxu1 %vm671_vm6, %v4683_v31  ;;  %1903 = vmatpush.msra.mxu0 %v1685_v30 }
 0x459   :  { %1904 = vmatpush.msra.mxu0 %v1682_v61 }
 0x45b   :  { %1905 = vmatpush.msra.mxu0 %v1602_v1 }
 0x45d   :  { %1906 = vmatpush.msra.mxu0 %v1679_v44 }
 0x45f   :  { %1907 = vmatpush.msra.mxu0 %v1676_v11 }
 0x461   :  { %1908 = vmatpush.msra.mxu0 %v4608_v63 }
 0x463   :  { %1909 = vmatpush.msra.mxu0 %v4765_v9 }
 0x465   :  { %1910 = vmatpush.msra.mxu0 %v1628_v4 }
 0x467   :  { %1911 = vmatpush.msra.mxu0 %v4599_v41 }
 0x468   :  { %2540 = vmatmul.msk.f32.vlgmr.msra.gmra.mxu0 %vm671_vm6, %v4683_v31 }
 0x4af   :  { %v1713_v35 = vpop.f32.mrf.mxu2  ;;  %v1733_v55 = vpop.f32.mrf.mxu3 }
 0x4b0   :  { %v1734_v15 = vadd.f32 %v1733_v55, %v1691_v20  ;;  %v1714_v16 = vadd.f32 %v1713_v35, %v1691_v20 }
 0x4b2   :  { %v4872_v54 = vmax.f32 %v1734_v15, 0.0  ;;  %v4874_v60 = vmax.f32 %v1714_v16, 0.0 }
 0x4c0   :  { %v1753_v25 = vpop.f32.mrf.mxu0 }
 0x4c1   :  { %v1773_v24 = vpop.f32.mrf.mxu1  ;;  %v1754_v1 = vadd.f32 %v1753_v25, %v1691_v20 }
 0x4c2   :  { %v1774_v7 = vadd.f32 %v1773_v24, %v1691_v20  ;;  %v1793_v36 = vpop.f32.mrf.mxu2 }
 0x4c3   :  { %v1794_v22 = vadd.f32 %v1793_v36, %v1691_v20  ;;  %v4842_v43 = vmax.f32 %v1754_v1, 0.0  ;;  %v4936_v1 = vld [vmem:[%s5176_s5] sm:$0xff] }
 0x4c4   :  { %v1813_v23 = vpop.f32.mrf.mxu3  ;;  %v4838_v5 = vmax.f32 %v1774_v7, 0.0 }
 0x4c5   :  { %v4840_v63 = vmax.f32 %v1794_v22, 0.0  ;;  %v1814_v0 = vadd.f32 %v1813_v23, %v1691_v20 }
 0x4c7   :  { %v4844_v41 = vmax.f32 %v1814_v0, 0.0  ;;  %v3026_v59 = vpack.i.bf16 %v4840_v63, %v4838_v5 }
 0x4c9   :  { %v3021_v39 = vpack.i.bf16 %v4842_v43, %v4844_v41  ;;  %3027 = vrot.lane.b32.xlu2 %v3026_v59, %s3131_s26  ;;  %3017 = vrot.lane.b32.xlu0 %v3026_v59, %s3134_s13 }
 0x4cb   :  { %3022 = vrot.lane.b32.xlu1 %v3021_v39, %s3134_s13 }
 0x4d1   :  { %3032 = vrot.lane.b32.xlu0 %v3021_v39, %s3131_s26 }
 0x4d3   :  { %v1833_v33 = vpop.f32.mrf.mxu0 }
 0x4d4   :  { %v1834_v19 = vadd.f32 %v1833_v33, %v1691_v20  ;;  %v1853_v18 = vpop.f32.mrf.mxu1 }
 0x4d5   :  { %v1854_v29 = vadd.f32 %v1853_v18, %v1691_v20 }
 0x4d6   :  { %v4854_v26 = vmax.f32 %v1834_v19, 0.0 }
 0x4d7   :  { %v4856_v53 = vmax.f32 %v1854_v29, 0.0  ;;  %v1873_v57 = vpop.f32.mrf.mxu2 }
 0x4d8   :  { %v1874_v51 = vadd.f32 %v1873_v57, %v1691_v20  ;;  %v1893_v31 = vpop.f32.mrf.mxu3 }
 0x4d9   :  { %v4858_v2 = vadd.f32 %v1893_v31, %v1691_v20  ;;  %v3036_v50 = vpack.i.bf16 %v4856_v53, %v4854_v26 }
 0x4da   :  { %v4862_v46 = vmax.f32 %v1874_v51, 0.0 }
 0x4db   :  { %v1925_v37 = vmax.f32 %v4858_v2, 0.0  ;;  %3037 = vrot.lane.b32.xlu1 %v3036_v50, %s3134_s13  ;;  %3042 = vrot.lane.b32.xlu2 %v3036_v50, %s3131_s26 }
 0x4dd   :  { %v3046_v45 = vpack.i.bf16 %v1925_v37, %v4862_v46 }
 0x4df   :  { %3047 = vrot.lane.b32.xlu0 %v3046_v45, %s3134_s13 }
 0x4e3   :  { %3052 = vrot.lane.b32.xlu1 %v3046_v45, %s3131_s26 }
 0x4e5   :  { %v1913_v8 = vpop.f32.mrf.mxu0 }
 0x4e6   :  { %v1914_v40 = vadd.f32 %v1913_v8, %v1691_v20 }
 0x4e8   :  { %v1926_v38 = vmax.f32 %v1914_v40, 0.0 }
 0x4ea   :  { %v3061_v12 = vpack.i.bf16 %v1926_v38, %v4872_v54 }
 0x4eb   :  { %1953 = vrot.lane.b32.xlu1 %v4874_v60, %s3134_s13 }
 0x4ec   :  { %3057 = vrot.lane.b32.xlu2 %v3061_v12, %s3134_s13  ;;  %3062 = vrot.lane.b32.xlu0 %v3061_v12, %s3131_s26 }
 0x4f4   :  { %1995 = vperm.xlu0 %2564, %v1992_v14   ;;  %1927 = vrot.lane.b32.xlu2 %v4874_v60, %s3131_s26 }
 0x523   :  { %v3028_v42 = vpop.permute.xlu2 %3027 }
 0x524   :  { %v3030_v6 = vunpack.i.h.bf16 %v3028_v42  ;;  %v3029_v28 = vunpack.i.l.bf16 %v3028_v42 }
 0x526   :  { %v1949_v10 = vsel %vm500_vm1, %v3029_v28, %v3030_v6 }
 0x535   :  { %v4886_v32 = vpop.permute.xlu2 %3042 }
 0x536   :  { %v3044_v55 = vunpack.i.l.bf16 %v4886_v32 }
 0x53b   :  { %v3018_v62 = vpop.permute.xlu0 %3017 }
 0x53c   :  { %v3020_v27 = vunpack.i.h.bf16 %v3018_v62  ;;  %v3019_v3 = vunpack.i.l.bf16 %v3018_v62 }
 0x53d   :  { %v3023_v34 = vpop.permute.xlu1 %3022 }
 0x53e   :  { %v3025_v9 = vunpack.i.h.bf16 %v3023_v34  ;;  %v3024_v48 = vunpack.i.l.bf16 %v3023_v34  ;;  %v1975_v44 = vsel %vm1277_vm7, %v3019_v3, %v3020_v27 }
 0x53f   :  { %2028 = vmatpush.msrb.mxu2 %v1975_v44 }
 0x540   :  { %v1976_v49 = vsel %vm1277_vm7, %v3025_v9, %v3019_v3  ;;  %v4894_v13 = vsel %vm1277_vm7, %v3020_v27, %v3024_v48 }
 0x541   :  { %2008 = vmatpush.msra.mxu1 %v1976_v49  ;;  %2048 = vmatpush.msrb.mxu3 %v4894_v13 }
 0x542   :  { %2029 = vmatpush.msrb.mxu2 %v1949_v10 }
 0x543   :  { %v4899_v21 = vpop.permute.xlu0 %3032 }
 0x544   :  { %v3035_v4 = vunpack.i.h.bf16 %v4899_v21  ;;  %v3034_v11 = vunpack.i.l.bf16 %v4899_v21  ;;  %2030 = vmatpush.msrb.mxu2 %v4838_v5 }
 0x546   :  { %v4904_v52 = vpop.permute.xlu2 %3057  ;;  %2031 = vmatpush.msrb.mxu2 %v1976_v49  ;;  %v1950_v17 = vsel %vm500_vm1, %v3035_v4, %v3029_v28  ;;  %v4910_v58 = vsel %vm500_vm1, %v3030_v6, %v3034_v11  ;;  %v4930_v36 = vsel %vm500_vm1, %v3034_v11, %v3044_v55 }
 0x547   :  { %v3059_v47 = vunpack.i.l.bf16 %v4904_v52  ;;  %2009 = vmatpush.msra.mxu1 %v1950_v17  ;;  %2049 = vmatpush.msrb.mxu3 %v4910_v58  ;;  %v3060_v51 = vunpack.i.h.bf16 %v4904_v52 }
 0x548   :  { %2032 = vmatpush.msrb.mxu2 %v1950_v17 }
 0x549   :  { %2010 = vmatpush.msra.mxu1 %v4842_v43  ;;  %2050 = vmatpush.msrb.mxu3 %v4840_v63  ;;  %v1977_v30 = vsel %vm1277_vm7, %v3059_v47, %v3025_v9 }
 0x54a   :  { %2033 = vmatpush.msrb.mxu2 %v4842_v43 }
 0x54b   :  { %2011 = vmatpush.msra.mxu1 %v1977_v30  ;;  %2051 = vmatpush.msrb.mxu3 %v1975_v44 }
 0x54c   :  { %2034 = vmatpush.msrb.mxu2 %v1977_v30 }
 0x54d   :  { %v3038_v61 = vpop.permute.xlu1 %3037  ;;  %2052 = vmatpush.msrb.mxu3 %v1949_v10 }
 0x54e   :  { %v3039_v35 = vunpack.i.l.bf16 %v3038_v61  ;;  %v3040_v33 = vunpack.i.h.bf16 %v3038_v61  ;;  %v1928_v38 = vpop.permute.xlu2 %1927 }
 0x54f   :  { %2053 = vmatpush.msrb.mxu3 %v4838_v5 }
 0x550   :  { %v4925_v25 = vsel %vm1277_vm7, %v3024_v48, %v3039_v35  ;;  %v1972_v45 = vsel %vm1277_vm7, %v3039_v35, %v3040_v33 }
 0x551   :  { %2068 = vmatpush.msrb.mxu0 %v4925_v25  ;;  %v3048_v20 = vpop.permute.xlu0 %3047  ;;  %2054 = vmatpush.msrb.mxu3 %v1976_v49 }
 0x552   :  { %v3050_v24 = vunpack.i.h.bf16 %v3048_v20  ;;  %v3049_v7 = vunpack.i.l.bf16 %v3048_v20 }
 0x553   :  { %2069 = vmatpush.msrb.mxu0 %v4930_v36  ;;  %2055 = vmatpush.msrb.mxu3 %v1950_v17 }
 0x554   :  { %v1984_v59 = vsel %vm1277_vm7, %v3049_v7, %v3050_v24  ;;  %v1971_v19 = vsel %vm1277_vm7, %v3040_v33, %v3049_v7  ;;  %v1990_v16 = vsel %vm1277_vm7, %v3050_v24, %v3060_v51 }
 0x555   :  { %v3053_v22 = vpop.permute.xlu1 %3052  ;;  %2070 = vmatpush.msrb.mxu0 %v4844_v41  ;;  %2056 = vmatpush.msrb.mxu3 %v4842_v43  ;;  %v3045_v43 = vunpack.i.h.bf16 %v4886_v32 }
 0x556   :  { %v3055_v23 = vunpack.i.h.bf16 %v3053_v22  ;;  %v3054_v0 = vunpack.i.l.bf16 %v3053_v22  ;;  %2543 = vmatmul.msk.f32.vlgmr.msrb.gmra.mxu3 %vm671_vm6, %v4936_v1 }
 0x557   :  { %2071 = vmatpush.msrb.mxu0 %v4894_v13  ;;  %2128 = vmatpush.msra.mxu3 %v1984_v59 }
 0x558   :  { %v1981_v39 = vsel %vm500_vm1, %v3054_v0, %v3055_v23  ;;  %v1945_v29 = vsel %vm500_vm1, %v3045_v43, %v3054_v0 }
 0x559   :  { %2072 = vmatpush.msrb.mxu0 %v4910_v58  ;;  %2129 = vmatpush.msra.mxu3 %v1981_v39 }
 0x55b   :  { %2073 = vmatpush.msrb.mxu0 %v4840_v63  ;;  %2130 = vmatpush.msra.mxu3 %v4862_v46 }
 0x55d   :  { %2074 = vmatpush.msrb.mxu0 %v1975_v44  ;;  %2131 = vmatpush.msra.mxu3 %v1971_v19  ;;  %v1954_v15 = vpop.permute.xlu1 %1953 }
 0x55e   :  { %v3063_v18 = vpop.permute.xlu0 %3062  ;;  %v1978_v40 = vsel %vm1277_vm7, %v1954_v15, %v3059_v47 }
 0x55f   :  { %v3064_v57 = vunpack.i.l.bf16 %v3063_v18  ;;  %2075 = vmatpush.msrb.mxu0 %v1949_v10  ;;  %2132 = vmatpush.msra.mxu3 %v1945_v29  ;;  %v3065_v31 = vunpack.i.h.bf16 %v3063_v18 }
 0x561   :  { %2076 = vmatpush.msrb.mxu0 %v4838_v5  ;;  %v1951_v50 = vsel %vm500_vm1, %v3064_v57, %v3035_v4  ;;  %2133 = vmatpush.msra.mxu3 %v4856_v53  ;;  %v1946_v5 = vsel %vm500_vm1, %v3044_v55, %v3045_v43  ;;  %v1987_v8 = vsel %vm500_vm1, %v3055_v23, %v3065_v31 }
 0x562   :  { %2012 = vmatpush.msra.mxu1 %v1951_v50  ;;  %2035 = vmatpush.msrb.mxu2 %v1951_v50 }
 0x563   :  { %2544 = vmatmul.msk.f32.vlgmr.msrb.gmra.mxu0 %vm671_vm6, %v4936_v1  ;;  %2134 = vmatpush.msra.mxu3 %v1972_v45 }
 0x564   :  { %2148 = vmatpush.msra.mxu0 %v1990_v16  ;;  %2013 = vmatpush.msra.mxu1 %v4872_v54 }
 0x565   :  { %2036 = vmatpush.msrb.mxu2 %v4872_v54  ;;  %2135 = vmatpush.msra.mxu3 %v1946_v5  ;;  %v1952_v54 = vsel %vm500_vm1, %v1928_v38, %v3064_v57 }
 0x566   :  { %2149 = vmatpush.msra.mxu0 %v1987_v8  ;;  %2542 = vmatmul.msk.f32.vlgmr.msrb.gmra.mxu2 %vm671_vm6, %v4936_v1 }
 0x567   :  { %2108 = vmatpush.msra.mxu2 %v1971_v19  ;;  %2014 = vmatpush.msra.mxu1 %v1978_v40 }
 0x568   :  { %2150 = vmatpush.msra.mxu0 %v1925_v37  ;;  %2136 = vmatpush.msra.mxu3 %v4854_v26 }
 0x569   :  { %2109 = vmatpush.msra.mxu2 %v1945_v29  ;;  %2015 = vmatpush.msra.mxu1 %v1952_v54 }
 0x56a   :  { %2151 = vmatpush.msra.mxu0 %v1984_v59  ;;  %2547 = vmatmul.msk.f32.vlgmr.msra.gmra.mxu3 %vm671_vm6, %v4936_v1 }
 0x56b   :  { %2110 = vmatpush.msra.mxu2 %v4856_v53  ;;  %2016 = vmatpush.msra.mxu1 %v4874_v60 }
 0x56c   :  { %2152 = vmatpush.msra.mxu0 %v1981_v39  ;;  %2541 = vmatmul.msk.f32.vlgmr.msra.gmra.mxu1 %vm671_vm6, %v4936_v1 }
 0x56d   :  { %2088 = vmatpush.msrb.mxu1 %v1972_v45  ;;  %2111 = vmatpush.msra.mxu2 %v1972_v45 }
 0x56e   :  { %2153 = vmatpush.msra.mxu0 %v4862_v46 }
 0x56f   :  { %2089 = vmatpush.msrb.mxu1 %v1946_v5  ;;  %2112 = vmatpush.msra.mxu2 %v1946_v5 }
 0x570   :  { %2154 = vmatpush.msra.mxu0 %v1971_v19 }
 0x571   :  { %2090 = vmatpush.msrb.mxu1 %v4854_v26  ;;  %2113 = vmatpush.msra.mxu2 %v4854_v26 }
 0x572   :  { %2155 = vmatpush.msra.mxu0 %v1945_v29 }
 0x573   :  { %2091 = vmatpush.msrb.mxu1 %v4925_v25  ;;  %2114 = vmatpush.msra.mxu2 %v4925_v25 }
 0x574   :  { %2156 = vmatpush.msra.mxu0 %v4856_v53  ;;  %v1996_v53 = vpop.permute.xlu0 %1995 }
 0x575   :  { %2092 = vmatpush.msrb.mxu1 %v4930_v36  ;;  %2115 = vmatpush.msra.mxu2 %v4930_v36 }
 0x576   :  { %2548 = vmatmul.msk.f32.vlgmr.msra.gmra.mxu0 %vm671_vm6, %v4936_v1 }
 0x577   :  { %2093 = vmatpush.msrb.mxu1 %v4844_v41  ;;  %2116 = vmatpush.msra.mxu2 %v4844_v41 }
 0x578   :  { %2546 = vmatmul.msk.f32.vlgmr.msra.gmra.mxu2 %vm671_vm6, %v4936_v1 }
 0x579   :  { %2094 = vmatpush.msrb.mxu1 %v4894_v13 }
 0x57b   :  { %2095 = vmatpush.msrb.mxu1 %v4910_v58  ;;  %v2216_v58 = vld [vmem:[%s5172_s8 + $0x28] sm:$0xff] }
 0x57d   :  { %2096 = vmatpush.msrb.mxu1 %v4840_v63 }
 0x57e   :  { %2545 = vmatmul.msk.f32.vlgmr.msrb.gmra.mxu1 %vm671_vm6, %v4936_v1 }
 0x5d9   :  { %v2058_v26 = vpop.f32.mrf.mxu3 }
 0x5da   :  { %v2059_v2 = vadd.f32 %v2058_v26, %v1996_v53 }
 0x5dc   :  { %v5008_v37 = vmax.f32 %v2059_v2, 0.0  ;;  %v2215_v2 = vld [vmem:[%s5177_s6] sm:$0xff]  ;;  %s3135_s6 = smov 116  }
 0x5e0   :  { %v2078_v46 = vpop.f32.mrf.mxu0 }
 0x5e1   :  { %v2079_v60 = vadd.f32 %v2078_v46, %v1996_v53 }
 0x5e3   :  { %v5010_v41 = vmax.f32 %v2079_v60, 0.0 }
 0x5e5   :  { %v3071_v12 = vpack.i.bf16 %v5010_v41, %v5008_v37 }
 0x5e7   :  { %3072 = vrot.lane.b32.xlu2 %v3071_v12, %s3131_s26  ;;  %3067 = vrot.lane.b32.xlu1 %v3071_v12, %s3134_s13 }
 0x5e9   :  { %v2018_v42 = vpop.f32.mrf.mxu1  ;;  %v2038_v62 = vpop.f32.mrf.mxu2 }
 0x5ea   :  { %v5021_v32 = vadd.f32 %v2018_v42, %v1996_v53  ;;  %v2039_v9 = vadd.f32 %v2038_v62, %v1996_v53 }
 0x5ec   :  { %v2161_v10 = vmax.f32 %v5021_v32, 0.0  ;;  %v5025_v21 = vmax.f32 %v2039_v9, 0.0 }
 0x5ed   :  { %v2138_v63 = vpop.f32.mrf.mxu3 }
 0x5ee   :  { %v5016_v14 = vadd.f32 %v2138_v63, %v1996_v53 }
 0x5f0   :  { %v2167_v3 = vmax.f32 %v5016_v14, 0.0 }
 0x5f3   :  { %v2158_v27 = vpop.f32.mrf.mxu0 }
 0x5f4   :  { %v2159_v6 = vadd.f32 %v2158_v27, %v1996_v53 }
 0x5f6   :  { %v2168_v28 = vmax.f32 %v2159_v6, 0.0 }
 0x5f8   :  { %v3091_v34 = vpack.i.bf16 %v2168_v28, %v2167_v3 }
 0x5fa   :  { %3092 = vrot.lane.b32.xlu2 %v3091_v34, %s3134_s13 }
 0x5fb   :  { %v2098_v48 = vpop.f32.mrf.mxu1  ;;  %v2118_v44 = vpop.f32.mrf.mxu2 }
 0x5fc   :  { %v2099_v49 = vadd.f32 %v2098_v48, %v1996_v53  ;;  %v2119_v13 = vadd.f32 %v2118_v44, %v1996_v53 }
 0x5fe   :  { %v5027_v4 = vmax.f32 %v2099_v49, 0.0  ;;  %v5029_v11 = vmax.f32 %v2119_v13, 0.0 }
 0x600   :  { %v3076_v52 = vpack.i.bf16 %v5029_v11, %v5025_v21  ;;  %v3101_v17 = vpack.i.bf16 %v2161_v10, %v5027_v4 }
 0x602   :  { %3077 = vrot.lane.b32.xlu0 %v3076_v52, %s3134_s13  ;;  %3087 = vrot.lane.b32.xlu1 %v3076_v52, %s3131_s26 }
 0x603   :  { %3102 = vrot.lane.b32.xlu2 %v3101_v17, %s3131_s26 }
 0x60a   :  { %3097 = vrot.lane.b32.xlu1 %v3091_v34, %s3131_s26  ;;  %3082 = vrot.lane.b32.xlu0 %v3101_v17, %s3134_s13 }
 0x612   :  { %2219 = vperm.xlu0 %2564, %v2216_v58  }
 0x641   :  { %v3073_v47 = vpop.permute.xlu2 %3072 }
 0x642   :  { %v3075_v61 = vunpack.i.h.bf16 %v3073_v47  ;;  %v3074_v35 = vunpack.i.l.bf16 %v3073_v47 }
 0x644   :  { %v5051_v24 = vsel %vm500_vm1, %v3074_v35, %v3075_v61 }
 0x654   :  { %v3093_v7 = vpop.permute.xlu2 %3092 }
 0x655   :  { %v3094_v22 = vunpack.i.l.bf16 %v3093_v7  ;;  %v3095_v26 = vunpack.i.h.bf16 %v3093_v7 }
 0x657   :  { %v2214_v60 = vsel %vm1277_vm7, %v3094_v22, %v3095_v26 }
 0x659   :  { %v3068_v30 = vpop.permute.xlu1 %3067 }
 0x65a   :  { %v3070_v55 = vunpack.i.h.bf16 %v3068_v30  ;;  %v3069_v25 = vunpack.i.l.bf16 %v3068_v30 }
 0x65c   :  { %v5046_v20 = vsel %vm1277_vm7, %v3069_v25, %v3070_v55 }
 0x65d   :  { %2232 = vmatpush.msra.mxu1 %v5046_v20  ;;  %v3103_v43 = vpop.permute.xlu2 %3102 }
 0x65e   :  { %v3104_v18 = vunpack.i.l.bf16 %v3103_v43  ;;  %v3105_v15 = vunpack.i.h.bf16 %v3103_v43 }
 0x65f   :  { %2233 = vmatpush.msra.mxu1 %v5051_v24 }
 0x660   :  { %v2182_v54 = vsel %vm500_vm1, %v3075_v61, %v3104_v18 }
 0x661   :  { %2234 = vmatpush.msra.mxu1 %v5008_v37 }
 0x674   :  { %v3078_v36 = vpop.permute.xlu0 %3077  ;;  %v3088_v1 = vpop.permute.xlu1 %3087 }
 0x675   :  { %v3080_v23 = vunpack.i.h.bf16 %v3078_v36  ;;  %v3079_v0 = vunpack.i.l.bf16 %v3078_v36  ;;  %v3089_v59 = vunpack.i.l.bf16 %v3088_v1  ;;  %v3090_v51 = vunpack.i.h.bf16 %v3088_v1 }
 0x677   :  { %v2201_v39 = vsel %vm1277_vm7, %v3079_v0, %v3069_v25  ;;  %v2208_v33 = vsel %vm1277_vm7, %v3080_v23, %v3094_v22  ;;  %v2184_v19 = vsel %vm500_vm1, %v3089_v59, %v3074_v35  ;;  %v2185_v38 = vsel %vm500_vm1, %v3105_v15, %v3089_v59  ;;  %v2374_v25 = vld [vmem:[%s5172_s8 + $0x30] sm:$0xff]  ;;  %v2373_v15 = vld [vmem:[%s5179_s7] sm:$0xff] }
 0x678   :  { %2235 = vmatpush.msra.mxu1 %v2201_v39  ;;  %2292 = vmatpush.msrb.mxu0 %v2208_v33  ;;  %v2181_v53 = vsel %vm500_vm1, %v3104_v18, %v3090_v51 }
 0x67a   :  { %2236 = vmatpush.msra.mxu1 %v2184_v19 }
 0x67c   :  { %v3083_v29 = vpop.permute.xlu0 %3082  ;;  %v3098_v57 = vpop.permute.xlu1 %3097  ;;  %2237 = vmatpush.msra.mxu1 %v5025_v21 }
 0x67d   :  { %v3085_v31 = vunpack.i.h.bf16 %v3083_v29  ;;  %v3084_v50 = vunpack.i.l.bf16 %v3083_v29  ;;  %v3099_v45 = vunpack.i.l.bf16 %v3098_v57  ;;  %v3100_v46 = vunpack.i.h.bf16 %v3098_v57 }
 0x67f   :  { %v2202_v16 = vsel %vm1277_vm7, %v3085_v31, %v3079_v0  ;;  %v2199_v5 = vsel %vm1277_vm7, %v3070_v55, %v3084_v50  ;;  %v2198_v8 = vsel %vm1277_vm7, %v3084_v50, %v3080_v23  ;;  %v2205_v40 = vsel %vm500_vm1, %v3090_v51, %v3099_v45 }
 0x680   :  { %2238 = vmatpush.msra.mxu1 %v2202_v16  ;;  %2252 = vmatpush.msrb.mxu2 %v2199_v5  ;;  %v2211_v12 = vsel %vm500_vm1, %v3099_v45, %v3100_v46 }
 0x681   :  { %2272 = vmatpush.msrb.mxu3 %v2198_v8  ;;  %2293 = vmatpush.msrb.mxu0 %v2205_v40 }
 0x682   :  { %2239 = vmatpush.msra.mxu1 %v2185_v38  ;;  %2253 = vmatpush.msrb.mxu2 %v2182_v54  ;;  %v2401_v38 = vld [vmem:[%s5180_s9] sm:$0xff] }
 0x683   :  { %2273 = vmatpush.msrb.mxu3 %v2181_v53  ;;  %2294 = vmatpush.msrb.mxu0 %v5029_v11 }
 0x684   :  { %2240 = vmatpush.msra.mxu1 %v2161_v10  ;;  %2254 = vmatpush.msrb.mxu2 %v5010_v41  ;;  %v2220_v14 = vpop.permute.xlu0 %2219  ;;  %v2434_v10 = vld [vmem:[%s5178_s10 + $0x8] sm:$0x3] }
 0x685   :  { %2274 = vmatpush.msrb.mxu3 %v5027_v4  ;;  %2295 = vmatpush.msrb.mxu0 %v2198_v8 }
 0x686   :  { %2549 = vmatmul.msk.f32.vlgmr.msra.gmra.mxu1 %vm671_vm6, %v2215_v2  ;;  %2255 = vmatpush.msrb.mxu2 %v5046_v20 }
 0x687   :  { %2312 = vmatpush.msrb.mxu1 %v2214_v60  ;;  %2275 = vmatpush.msrb.mxu3 %v2199_v5 }
 0x688   :  { %2296 = vmatpush.msrb.mxu0 %v2181_v53  ;;  %2256 = vmatpush.msrb.mxu2 %v5051_v24 }
 0x689   :  { %2313 = vmatpush.msrb.mxu1 %v2211_v12  ;;  %2276 = vmatpush.msrb.mxu3 %v2182_v54 }
 0x68a   :  { %2297 = vmatpush.msrb.mxu0 %v5027_v4  ;;  %2257 = vmatpush.msrb.mxu2 %v5008_v37 }
 0x68b   :  { %2314 = vmatpush.msrb.mxu1 %v2167_v3  ;;  %2277 = vmatpush.msrb.mxu3 %v5010_v41 }
 0x68c   :  { %2298 = vmatpush.msrb.mxu0 %v2199_v5  ;;  %2258 = vmatpush.msrb.mxu2 %v2201_v39 }
 0x68d   :  { %2315 = vmatpush.msrb.mxu1 %v2208_v33  ;;  %2278 = vmatpush.msrb.mxu3 %v5046_v20 }
 0x68e   :  { %2299 = vmatpush.msrb.mxu0 %v2182_v54  ;;  %2259 = vmatpush.msrb.mxu2 %v2184_v19 }
 0x68f   :  { %2316 = vmatpush.msrb.mxu1 %v2205_v40  ;;  %2279 = vmatpush.msrb.mxu3 %v5051_v24 }
 0x690   :  { %2300 = vmatpush.msrb.mxu0 %v5010_v41  ;;  %2260 = vmatpush.msrb.mxu2 %v5025_v21  ;;  %v2433_v21 = vld [vmem:[%s5178_s10] sm:$0xff] }
 0x691   :  { %2552 = vmatmul.msk.f32.vlgmr.msrb.gmra.mxu0 %vm671_vm6, %v2215_v2  ;;  %2317 = vmatpush.msrb.mxu1 %v5029_v11 }
 0x692   :  { %2280 = vmatpush.msrb.mxu3 %v5008_v37  ;;  %2550 = vmatmul.msk.f32.vlgmr.msrb.gmra.mxu2 %vm671_vm6, %v2215_v2 }
 0x693   :  { %2551 = vmatmul.msk.f32.vlgmr.msrb.gmra.mxu3 %vm671_vm6, %v2215_v2  ;;  %2318 = vmatpush.msrb.mxu1 %v2198_v8 }
 0x695   :  { %2319 = vmatpush.msrb.mxu1 %v2181_v53 }
 0x697   :  { %2320 = vmatpush.msrb.mxu1 %v5027_v4 }
 0x698   :  { %2553 = vmatmul.msk.f32.vlgmr.msrb.gmra.mxu1 %vm671_vm6, %v2215_v2 }
 0x703   :  { %v2242_v63 = vpop.f32.mrf.mxu1 }
 0x704   :  { %v2243_v49 = vadd.f32 %v2242_v63, %v2220_v14 }
 0x706   :  { %v2325_v13 = vmax.f32 %v2243_v49, 0.0 }
 0x70e   :  { %v2302_v41 = vpop.f32.mrf.mxu0 }
 0x70f   :  { %v2303_v42 = vadd.f32 %v2302_v41, %v2220_v14 }
 0x711   :  { %v2328_v3 = vmax.f32 %v2303_v42, 0.0 }
 0x715   :  { %v2322_v62 = vpop.f32.mrf.mxu1  ;;  %v2262_v9 = vpop.f32.mrf.mxu2 }
 0x716   :  { %v2323_v27 = vadd.f32 %v2322_v62, %v2220_v14  ;;  %v2282_v37 = vpop.f32.mrf.mxu3  ;;  %v2263_v48 = vadd.f32 %v2262_v9, %v2220_v14 }
 0x717   :  { %v2283_v34 = vadd.f32 %v2282_v37, %v2220_v14 }
 0x718   :  { %v2329_v6 = vmax.f32 %v2323_v27, 0.0  ;;  %v2326_v44 = vmax.f32 %v2263_v48, 0.0 }
 0x719   :  { %v2327_v32 = vmax.f32 %v2283_v34, 0.0 }
 0x71a   :  { %v3116_v28 = vpack.i.bf16 %v2329_v6, %v2328_v3 }
 0x71c   :  { %3117 = vrot.lane.b32.xlu0 %v3116_v28, %s3131_s26  ;;  %3112 = vrot.lane.b32.xlu2 %v3116_v28, %s3134_s13 }
 0x71d   :  { %3107 = vrot.lane.b32.xlu1 %v3116_v28, %s3135_s6 }
 0x724   :  { %2346 = vrot.lane.b32.xlu0 %v2327_v32, %s3131_s26  ;;  %2349 = vrot.lane.b32.xlu2 %v2327_v32, %s3134_s13 }
 0x725   :  { %2352 = vrot.lane.b32.xlu1 %v2327_v32, %s3135_s6 }
 0x72c   :  { %2332 = vrot.lane.b32.xlu0 %v2326_v44, %s3131_s26  ;;  %2337 = vrot.lane.b32.xlu2 %v2326_v44, %s3134_s13 }
 0x72d   :  { %2342 = vrot.lane.b32.xlu1 %v2326_v44, %s3135_s6 }
 0x734   :  { %2330 = vrot.lane.b32.xlu0 %v2325_v13, %s3131_s26  ;;  %2335 = vrot.lane.b32.xlu2 %v2325_v13, %s3134_s13 }
 0x735   :  { %2340 = vrot.lane.b32.xlu1 %v2325_v13, %s3135_s6 }
 0x73c   :  { %2442 = vperm.xlu0 %2564, %v2434_v10   ;;  %2437 = vperm.xlu2 %2765, %v2433_v21  }
 0x73d   :  { %2377 = vperm.xlu1 %3121, %v2374_v25  }
 0x776   :  { %v3113_v4 = vpop.permute.xlu2 %3112 }
 0x777   :  { %v3115_v17 = vunpack.i.h.bf16 %v3113_v4  ;;  %v3114_v58 = vunpack.i.l.bf16 %v3113_v4 }
 0x779   :  { %v2369_v20 = vsel %vm1277_vm7, %v3114_v58, %v3115_v17 }
 0x77e   :  { %v2350_v24 = vpop.permute.xlu2 %2349 }
 0x77f   :  { %v2360_v23 = vsel %vm1277_vm7, %v2350_v24, %v3114_v58 }
 0x786   :  { %v2338_v59 = vpop.permute.xlu2 %2337 }
 0x787   :  { %v2351_v19 = vsel %vm1277_vm7, %v2338_v59, %v2350_v24 }
 0x78e   :  { %v3118_v11 = vpop.permute.xlu0 %3117  ;;  %v2336_v57 = vpop.permute.xlu2 %2335 }
 0x78f   :  { %v3108_v52 = vpop.permute.xlu1 %3107  ;;  %v3120_v61 = vunpack.i.h.bf16 %v3118_v11  ;;  %v3119_v35 = vunpack.i.l.bf16 %v3118_v11  ;;  %v2339_v50 = vsel %vm1277_vm7, %v2336_v57, %v2338_v59 }
 0x790   :  { %v3110_v47 = vunpack.i.h.bf16 %v3108_v52  ;;  %v3109_v30 = vunpack.i.l.bf16 %v3108_v52 }
 0x791   :  { %v2366_v7 = vsel %vm500_vm1, %v3119_v35, %v3120_v61 }
 0x792   :  { %v2372_v55 = vsel %vm2344_vm8, %v3109_v30, %v3110_v47 }
 0x793   :  { %2380 = vmatpush.msra.mxu2 %v2372_v55 }
 0x795   :  { %2381 = vmatpush.msra.mxu2 %v2369_v20 }
 0x796   :  { %v2347_v36 = vpop.permute.xlu0 %2346  ;;  %v2438_v26 = vpop.permute.xlu2 %2437 }
 0x797   :  { %v2353_v1 = vpop.permute.xlu1 %2352  ;;  %2382 = vmatpush.msra.mxu2 %v2366_v7  ;;  %v2357_v0 = vsel %vm500_vm1, %v2347_v36, %v3119_v35 }
 0x798   :  { %v2363_v22 = vsel %vm2344_vm8, %v2353_v1, %v3109_v30 }
 0x799   :  { %2383 = vmatpush.msra.mxu2 %v2328_v3 }
 0x79b   :  { %2384 = vmatpush.msra.mxu2 %v2363_v22 }
 0x79d   :  { %2385 = vmatpush.msra.mxu2 %v2360_v23 }
 0x79e   :  { %v2333_v33 = vpop.permute.xlu0 %2332 }
 0x79f   :  { %v2343_v39 = vpop.permute.xlu1 %2342  ;;  %2386 = vmatpush.msra.mxu2 %v2357_v0  ;;  %v2348_v18 = vsel %vm500_vm1, %v2333_v33, %v2347_v36 }
 0x7a0   :  { %v2354_v43 = vsel %vm2344_vm8, %v2343_v39, %v2353_v1 }
 0x7a1   :  { %2387 = vmatpush.msra.mxu2 %v2327_v32 }
 0x7a3   :  { %2388 = vmatpush.msra.mxu2 %v2354_v43 }
 0x7a5   :  { %2389 = vmatpush.msra.mxu2 %v2351_v19 }
 0x7a6   :  { %v2331_v31 = vpop.permute.xlu0 %2330 }
 0x7a7   :  { %2390 = vmatpush.msra.mxu2 %v2348_v18  ;;  %v2341_v29 = vpop.permute.xlu1 %2340  ;;  %v2334_v45 = vsel %vm500_vm1, %v2331_v31, %v2333_v33 }
 0x7a8   :  { %v2345_v51 = vsel %vm2344_vm8, %v2341_v29, %v2343_v39 }
 0x7a9   :  { %2391 = vmatpush.msra.mxu2 %v2326_v44 }
 0x7ab   :  { %2392 = vmatpush.msra.mxu2 %v2345_v51 }
 0x7ad   :  { %2393 = vmatpush.msra.mxu2 %v2339_v50 }
 0x7ae   :  { %v2443_v2 = vpop.permute.xlu0 %2442 }
 0x7af   :  { %2394 = vmatpush.msra.mxu2 %v2334_v45  ;;  %v2378_v16 = vpop.permute.xlu1 %2377 }
 0x7b1   :  { %2395 = vmatpush.msra.mxu2 %v2325_v13 }
 0x7b2   :  { %2396 = vmatmul.f32.vlgmr.msra.gmra.mxu2 %v2373_v15 }
 0x835   :  { %v2397_v5 = vpop.f32.mrf.mxu2 }
 0x836   :  { %v2398_v8 = vadd.f32 %v2397_v5, %v2378_v16 }
 0x838   :  { %v2400_v40 = vmax.f32 %v2398_v8, 0.0 }
 0x83a   :  { %2425 = vmatpush.msra.mxu3 %v2400_v40 }
 0x83b   :  { %2554 = vmatmul.msk.f32.vlgmr.msra.gmra.mxu3 %vm2403_vm9, %v2401_v38 }
 0x843   :  { %2555 = vmatmul.msk.f32.gmra.mxu3 %vm2403_vm9, %v2402_v56 }
 0x8be   :  { %v2427_v54 = vpop.f32.mrf.mxu3 }
 0x8bf   :  { %v2445_v53 = vadd.f32 %v2438_v26, %v2427_v54 }
 0x8c1   :  { %v2448_v12 = vsel %vm2447_vm10, %v2445_v53, -inf }
 0x8c6   :  { %v2430_v46 = vpop.f32.mrf.mxu3 }
 0x8c7   :  { %v2446_v60 = vadd.f32 %v2443_v2, %v2430_v46 }
 0x8c9   :  { %v2450_v63 = vsel %vm2449_vm11, %v2446_v60, -inf }
 0x8ca   :  { %v2451_v41 = vmax.f32 %v2448_v12, %v2450_v63 }
 0x8cc   :  { %v2452_v14 = vrot.slane %v2451_v41, 4 }
 0x8ce   :  { %v2453_v42 = vmax.f32 %v2451_v41, %v2452_v14 }
 0x8d0   :  { %v2454_v62 = vrot.slane %v2453_v42, 2 }
 0x8d2   :  { %v2455_v27 = vmax.f32 %v2453_v42, %v2454_v62 }
 0x8d4   :  { %v2456_v3 = vrot.slane %v2455_v27, 1 }
 0x8d6   :  { %v2457_v6 = vmax.f32 %v2455_v27, %v2456_v3 }
 0x8d8   :  { %v2458_v28 = vsub.f32 %v2445_v53, %v2457_v6  ;;  %v2459_v37 = vsub.f32 %v2446_v60, %v2457_v6 }
 0x8da   :  { %v2460_v34 = vmul.f32 1.442695, %v2458_v28  ;;  %v2462_v32 = vmul.f32 1.442695, %v2459_v37 }
 0x8dc   :  { %3122 = vpow2.f32 %v2460_v34 }
 0x8dd   :  { %3124 = vpow2.f32 %v2462_v32 }
 0x8e2   :  { %v3123_v9 = vpop.eup %3122 }
 0x8e3   :  { %v3125_v48 = vpop.eup %3124  ;;  %v2464_v44 = vsel %vm2447_vm10, %v3123_v9, 0.0 }
 0x8e4   :  { %v2465_v49 = vsel %vm2449_vm11, %v3125_v48, 0.0 }
 0x8e5   :  { %v2466_v13 = vadd.f32 %v2465_v49, %v2464_v44 }
 0x8e7   :  { %v2467_v10 = vrot.slane %v2466_v13, 4 }
 0x8e9   :  { %v2468_v21 = vadd.f32 %v2467_v10, %v2466_v13 }
 0x8eb   :  { %v2469_v4 = vrot.slane %v2468_v21, 2 }
 0x8ed   :  { %v2470_v11 = vadd.f32 %v2469_v4, %v2468_v21 }
 0x8ef   :  { %v2471_v52 = vrot.slane %v2470_v11, 1 }
 0x8f1   :  { %v2472_v17 = vadd.f32 %v2471_v52, %v2470_v11 }
 0x8f3   :  { %3126 = vlog2.f32 %v2472_v17 }
 0x8f9   :  { %v3127_v58 = vpop.eup %3126 }
 0x8fa   :  { %v2474_v47 = vmul.f32 0.6931472, %v3127_v58 }
 0x8fc   :  { %v2475_v30 = vadd.f32 %v2474_v47, %v2457_v6 }
 0x8fe   :  { %v2476_v61 = vsub.f32 %v2445_v53, %v2475_v30  ;;  %v2477_v35 = vsub.f32 %v2446_v60, %v2475_v30 }
 0x900   :  { %2478 = vst.msk [vmem:[%s5181_s11] sm:$0xff] %vm2447_vm10, %v2476_v61 }
 0x901   :  { %2479 = vst.msk [vmem:[%s5181_s11 + $0x8] sm:$0x3] %vm2449_vm11, %v2477_v35 }

</bundles_post_ra>
